<compile_context>
chip_gen: v7x
topology: tpu7x:2x2x1
jax: 0.10.0
libtpu: 0.0.40
codegen_flags: <defaults>
</compile_context>

<pallas_src>
import jax
import jax.numpy as jnp
from jax.experimental import pallas as pl
from jax.experimental.pallas import tpu as pltpu


# -----------------------------------------------------------------------------
# Helpers
# -----------------------------------------------------------------------------
def _round_up(x, m):
    return ((x + m - 1) // m) * m


def _pick_tile(n, preferred):
    for t in preferred:
        if t <= n and n % t == 0:
            return t
    return n


def _pad_wb(w, b, co_pad, ci_pad):
    """Zero-pad a (C_out, C_in) weight and (C_out,) bias to padded channel dims."""
    co, ci = w.shape
    w_p = jnp.zeros((co_pad, ci_pad), w.dtype).at[:co, :ci].set(w)
    b_p = jnp.zeros((co_pad, 1), b.dtype).at[:co, 0].set(b)
    return w_p, b_p


# -----------------------------------------------------------------------------
# Kernel 1: q/k/v projections (1x1 conv + folded BN + ReLU), channels-first.
# -----------------------------------------------------------------------------
def _project_qkv_kernel(
    qf_ref,            # (1, Cq, TN)  query_feats tile (NCHW view)
    kf_ref,            # (1, Ck, TN)  key_feats tile
    wq1_ref, bq1_ref,  # (T, Cq), (T, 1)
    wq2_ref, bq2_ref,  # (T, T),  (T, 1)   (softmax scale folded in)
    wk1_ref, bk1_ref,  # (T, Ck), (T, 1)
    wk2_ref, bk2_ref,  # (T, T),  (T, 1)
    wv_ref, bv_ref,    # (T, Ck), (T, 1)
    q_out_ref,         # (1, TN, T)  bf16  (token-major for kernel 2)
    k_out_ref,         # (1, T, TN)  bf16
    v_out_ref,         # (1, T, TN)  bf16
):
    xq = qf_ref[0].astype(jnp.float32)   # (Cq, TN)
    xk = kf_ref[0].astype(jnp.float32)   # (Ck, TN)

    def proj(w_ref, x, b_ref):
        y = jnp.dot(w_ref[...], x, preferred_element_type=jnp.float32)
        return jnp.maximum(y + b_ref[...], 0.0)

    q = proj(wq2_ref, proj(wq1_ref, xq, bq1_ref), bq2_ref)   # (T, TN), scaled
    k = proj(wk2_ref, proj(wk1_ref, xk, bk1_ref), bk2_ref)   # (T, TN)
    v = proj(wv_ref, xk, bv_ref)                             # (T, TN)

    q_out_ref[0] = q.T.astype(q_out_ref.dtype)   # one small XLU transpose/tile
    k_out_ref[0] = k.astype(k_out_ref.dtype)
    v_out_ref[0] = v.astype(v_out_ref.dtype)


# -----------------------------------------------------------------------------
# Kernel 2: flash-style attention (online softmax) + out_project.
# -----------------------------------------------------------------------------
def _flash_attn_kernel(
    q_ref,     # (1, TQ, T)  bf16, scale pre-folded
    k_ref,     # (1, T, TK)  bf16
    v_ref,     # (1, T, TK)  bf16
    wo_ref,    # (Co_pad, T) f32
    bo_ref,    # (Co_pad, 1) f32
    out_ref,   # (1, Co_pad, TQ) f32  (channels-first, lane-dense)
    m_sc,      # (TQ, 1) f32 running max
    l_sc,      # (TQ, 1) f32 running denominator
    acc_sc,    # (TQ, T) f32 running numerator
):
    ki = pl.program_id(2)

    @pl.when(ki == 0)
    def _():
        m_sc[...] = jnp.full_like(m_sc, -jnp.inf)
        l_sc[...] = jnp.zeros_like(l_sc)
        acc_sc[...] = jnp.zeros_like(acc_sc)

    q = q_ref[0]   # (TQ, T) bf16
    k = k_ref[0]   # (T, TK) bf16
    v = v_ref[0]   # (T, TK) bf16

    # sim tile = q @ k  (bf16 MXU inputs, f32 accumulation, no transposes)
    s = jax.lax.dot_general(q, k, (((1,), (0,)), ((), ())),
                            preferred_element_type=jnp.float32)   # (TQ, TK)

    m_prev = m_sc[...]
    m_new = jnp.maximum(m_prev, jnp.max(s, axis=-1, keepdims=True))
    alpha = jnp.exp(m_prev - m_new)
    p = jnp.exp(s - m_new)                                         # (TQ, TK)
    l_sc[...] = alpha * l_sc[...] + jnp.sum(p, axis=-1, keepdims=True)
    # acc += p @ v^T   (A @ B^T form: contract last dims, bf16 inputs)
    pv = jax.lax.dot_general(p.astype(v.dtype), v, (((1,), (1,)), ((), ())),
                             preferred_element_type=jnp.float32)   # (TQ, T)
    acc_sc[...] = alpha * acc_sc[...] + pv
    m_sc[...] = m_new

    @pl.when(ki == pl.num_programs(2) - 1)
    def _():
        inv_l = pl.reciprocal(l_sc[...], approx=True)              # (TQ, 1)
        ctx = acc_sc[...] * inv_l                                  # (TQ, T)
        # out_project in channels-first form: relu(Wo @ ctx^T + bo)
        o = jax.lax.dot_general(wo_ref[...], ctx, (((1,), (1,)), ((), ())),
                                preferred_element_type=jnp.float32)  # (Co_pad, TQ)
        o = jnp.maximum(o + bo_ref[...], 0.0)
        out_ref[0] = o.astype(out_ref.dtype)


# -----------------------------------------------------------------------------
# Wrapper
# -----------------------------------------------------------------------------
def self_attention_block(query_feats, key_feats, params, transform_channels):
    """query_feats/key_feats: NCHW float32. params: folded conv+BN weights
    (C_out, C_in) and biases (C_out,). Returns NCHW float32 output."""
    B, Cq, H, W = query_feats.shape
    _, Ck, _, _ = key_feats.shape
    N = H * W
    T = transform_channels
    Co = params["wo"].shape[0]

    T_pad = _round_up(T, 128)    # MXU-friendly transform dim
    Co_pad = _round_up(Co, 128)  # lane-dense output stores

    # Tile sizes over the token axis.  Modest per-step working set (<~2 MiB)
    # fits comfortably on v5e/v6e (128 MiB VMEM) and v7x (64 MiB VMEM).
    TN = _pick_tile(N, (512, 256, 128))   # projection token tile
    TQ = _pick_tile(N, (128, 256, 512))   # query tile (more parallel iters)
    TK = _pick_tile(N, (512, 256, 128))   # kv tile

    # Channels-first token views (reshape only -- no HBM transpose pass).
    qf = query_feats.reshape(B, Cq, N)
    kf = key_feats.reshape(B, Ck, N)

    # Fold the 1/sqrt(T) softmax scale into the last query-projection layer
    # (ReLU commutes with a positive scale), and zero-pad channels.
    scale = float(T) ** -0.5
    wq1, bq1 = _pad_wb(params["wq1"], params["bq1"], T_pad, Cq)
    wq2, bq2 = _pad_wb(params["wq2"] * scale, params["bq2"] * scale, T_pad, T_pad)
    wk1, bk1 = _pad_wb(params["wk1"], params["bk1"], T_pad, Ck)
    wk2, bk2 = _pad_wb(params["wk2"], params["bk2"], T_pad, T_pad)
    wv, bv = _pad_wb(params["wv"], params["bv"], T_pad, Ck)
    wo, bo = _pad_wb(params["wo"], params["bo"], Co_pad, T_pad)

    # ---------------- Kernel 1: q/k/v projections ----------------
    proj_weights = [wq1, bq1, wq2, bq2, wk1, bk1, wk2, bk2, wv, bv]
    w_specs = [pl.BlockSpec(w.shape, lambda b, n: (0, 0)) for w in proj_weights]

    q_tok, k_cn, v_cn = pl.pallas_call(
        _project_qkv_kernel,
        out_shape=(
            jax.ShapeDtypeStruct((B, N, T_pad), jnp.bfloat16),
            jax.ShapeDtypeStruct((B, T_pad, N), jnp.bfloat16),
            jax.ShapeDtypeStruct((B, T_pad, N), jnp.bfloat16),
        ),
        grid_spec=pltpu.PrefetchScalarGridSpec(
            num_scalar_prefetch=0,
            grid=(B, N // TN),
            in_specs=[
                pl.BlockSpec((1, Cq, TN), lambda b, n: (b, 0, n)),
                pl.BlockSpec((1, Ck, TN), lambda b, n: (b, 0, n)),
                *w_specs,
            ],
            out_specs=(
                pl.BlockSpec((1, TN, T_pad), lambda b, n: (b, n, 0)),
                pl.BlockSpec((1, T_pad, TN), lambda b, n: (b, 0, n)),
                pl.BlockSpec((1, T_pad, TN), lambda b, n: (b, 0, n)),
            ),
        ),
        compiler_params=pltpu.CompilerParams(
            dimension_semantics=("parallel", "parallel"),
            vmem_limit_bytes=32 * 1024 * 1024,
        ),
    )(qf, kf, *proj_weights)

    # ---------------- Kernel 2: flash attention + out_project ----------------
    out_padded = pl.pallas_call(
        _flash_attn_kernel,
        out_shape=jax.ShapeDtypeStruct((B, Co_pad, N), jnp.float32),
        grid_spec=pltpu.PrefetchScalarGridSpec(
            num_scalar_prefetch=0,
            grid=(B, N // TQ, N // TK),
            in_specs=[
                pl.BlockSpec((1, TQ, T_pad), lambda b, qi, ki: (b, qi, 0)),
                pl.BlockSpec((1, T_pad, TK), lambda b, qi, ki: (b, 0, ki)),
                pl.BlockSpec((1, T_pad, TK), lambda b, qi, ki: (b, 0, ki)),
                pl.BlockSpec(wo.shape, lambda b, qi, ki: (0, 0)),
                pl.BlockSpec(bo.shape, lambda b, qi, ki: (0, 0)),
            ],
            out_specs=pl.BlockSpec((1, Co_pad, TQ), lambda b, qi, ki: (b, 0, qi)),
            scratch_shapes=[
                pltpu.VMEM((TQ, 1), jnp.float32),       # running max
                pltpu.VMEM((TQ, 1), jnp.float32),       # running denominator
                pltpu.VMEM((TQ, T_pad), jnp.float32),   # running numerator
            ],
        ),
        compiler_params=pltpu.CompilerParams(
            dimension_semantics=("parallel", "parallel", "arbitrary"),
            vmem_limit_bytes=32 * 1024 * 1024,
        ),
    )(q_tok, k_cn, v_cn, wo, bo)

    # Slice off padded output channels; reshape back to NCHW.
    return out_padded[:, :Co, :].reshape(B, Co, H, W)


# -----------------------------------------------------------------------------
# Deterministic parameter construction (conv 1x1, no bias + eval-mode BN, folded)
# Weights are (C_out, C_in); biases are (C_out,).
# -----------------------------------------------------------------------------
def _make_layer(key, c_in, c_out, eps=1e-5):
    kw, kg, kb, km, kv = jax.random.split(key, 5)
    w = jax.random.normal(kw, (c_out, c_in), jnp.float32) * 0.1
    gamma = 1.0 + 0.1 * jax.random.normal(kg, (c_out,), jnp.float32)
    beta = 0.1 * jax.random.normal(kb, (c_out,), jnp.float32)
    mean = 0.1 * jax.random.normal(km, (c_out,), jnp.float32)
    var = jax.random.uniform(kv, (c_out,), jnp.float32, 0.5, 1.5)
    s = gamma / jnp.sqrt(var + eps)
    w_eff = s[:, None] * w           # (c_out, c_in)
    b_eff = beta - s * mean          # (c_out,)
    return w_eff, b_eff


def build_params(key, key_in_c, query_in_c, transform_c, out_c):
    ks = jax.random.split(key, 6)
    wq1, bq1 = _make_layer(ks[0], query_in_c, transform_c)
    wq2, bq2 = _make_layer(ks[1], transform_c, transform_c)
    wk1, bk1 = _make_layer(ks[2], key_in_c, transform_c)
    wk2, bk2 = _make_layer(ks[3], transform_c, transform_c)
    wv, bv = _make_layer(ks[4], key_in_c, transform_c)
    wo, bo = _make_layer(ks[5], transform_c, out_c)
    return dict(wq1=wq1, bq1=bq1, wq2=wq2, bq2=bq2,
                wk1=wk1, bk1=bk1, wk2=wk2, bk2=bk2,
                wv=wv, bv=bv, wo=wo, bo=bo)


# -----------------------------------------------------------------------------
# Pure-JAX reference (same math, no Pallas) for the correctness check
# -----------------------------------------------------------------------------
def reference_forward(query_feats, key_feats, p, transform_c):
    B, Cq, H, W = query_feats.shape
    _, Ck, _, _ = key_feats.shape
    N = H * W
    qf = query_feats.reshape(B, Cq, N)
    kf = key_feats.reshape(B, Ck, N)

    def proj(w, x, b):
        return jnp.maximum(jnp.einsum("oc,bcn->bon", w, x) + b[None, :, None], 0.0)

    q = proj(p["wq2"], proj(p["wq1"], qf, p["bq1"]), p["bq2"])   # (B, T, N)
    k = proj(p["wk2"], proj(p["wk1"], kf, p["bk1"]), p["bk2"])   # (B, T, N)
    v = proj(p["wv"], kf, p["bv"])                               # (B, T, N)
    sim = jnp.einsum("btn,btm->bnm", q, k) * (float(transform_c) ** -0.5)
    sim = jax.nn.softmax(sim, axis=-1)
    ctx = jnp.einsum("bnm,btm->btn", sim, v)                     # (B, T, N)
    out = jnp.maximum(jnp.einsum("ot,btn->bon", p["wo"], ctx)
                      + p["bo"][None, :, None], 0.0)
    Co = p["wo"].shape[0]
    return out.reshape(B, Co, H, W)


if __name__ == "__main__":
    key = jax.random.PRNGKey(0)
    k_q, k_k, k_p = jax.random.split(key, 3)

    # Small shapes consistent with the module.
    B, C_in, H, W = 2, 4, 16, 16
    transform_channels = 32
    out_channels = 4

    query_feats = jax.random.normal(k_q, (B, C_in, H, W), jnp.float32)
    key_feats = jax.random.normal(k_k, (B, C_in, H, W), jnp.float32)
    params = build_params(k_p, C_in, C_in, transform_channels, out_channels)

    out = self_attention_block(query_feats, key_feats, params, transform_channels)
    out = jax.block_until_ready(out)

    ref = reference_forward(query_feats, key_feats, params, transform_channels)
    assert out.shape == (B, out_channels, H, W)
    # bf16 MXU inputs (QK^T, P@V) -> looser tolerance than a pure-f32 path.
    assert jnp.allclose(out, ref, rtol=2e-2, atol=2e-2), "mismatch vs reference"

    print("KERNEL_OK")
</pallas_src>

<mosaic_0001>
module attributes {stable_mosaic.version = 11 : i64} {
  func.func @_project_qkv_kernel(%arg0: i32, %arg1: i32, %arg2: memref<1x4x256xf32, #tpu.memory_space<vmem>>, %arg3: memref<1x4x256xf32, #tpu.memory_space<vmem>>, %arg4: memref<128x4xf32, #tpu.memory_space<vmem>>, %arg5: memref<128x1xf32, #tpu.memory_space<vmem>>, %arg6: memref<128x128xf32, #tpu.memory_space<vmem>>, %arg7: memref<128x1xf32, #tpu.memory_space<vmem>>, %arg8: memref<128x4xf32, #tpu.memory_space<vmem>>, %arg9: memref<128x1xf32, #tpu.memory_space<vmem>>, %arg10: memref<128x128xf32, #tpu.memory_space<vmem>>, %arg11: memref<128x1xf32, #tpu.memory_space<vmem>>, %arg12: memref<128x4xf32, #tpu.memory_space<vmem>>, %arg13: memref<128x1xf32, #tpu.memory_space<vmem>>, %arg14: memref<1x256x128xbf16, #tpu.memory_space<vmem>>, %arg15: memref<1x128x256xbf16, #tpu.memory_space<vmem>>, %arg16: memref<1x128x256xbf16, #tpu.memory_space<vmem>>) attributes {dimension_semantics = [#tpu.dimension_semantics<parallel>, #tpu.dimension_semantics<parallel>], iteration_bounds = array<i64: 2, 1>, scalar_prefetch = 0 : i64, scratch_operands = 0 : i64, tpu.core_type = #tpu.core_type<tc>, window_params = [{transform_indices = @transform_0, window_bounds = array<i64: 1, 4, 256>}, {transform_indices = @transform_1, window_bounds = array<i64: 1, 4, 256>}, {pipeline_mode = #tpu.pipeline_mode<synchronous>, transform_indices = @transform_2, window_bounds = array<i64: 128, 4>}, {pipeline_mode = #tpu.pipeline_mode<synchronous>, transform_indices = @transform_3, window_bounds = array<i64: 128, 1>}, {pipeline_mode = #tpu.pipeline_mode<synchronous>, transform_indices = @transform_4, window_bounds = array<i64: 128, 128>}, {pipeline_mode = #tpu.pipeline_mode<synchronous>, transform_indices = @transform_5, window_bounds = array<i64: 128, 1>}, {pipeline_mode = #tpu.pipeline_mode<synchronous>, transform_indices = @transform_6, window_bounds = array<i64: 128, 4>}, {pipeline_mode = #tpu.pipeline_mode<synchronous>, transform_indices = @transform_7, window_bounds = array<i64: 128, 1>}, {pipeline_mode = #tpu.pipeline_mode<synchronous>, transform_indices = @transform_8, window_bounds = array<i64: 128, 128>}, {pipeline_mode = #tpu.pipeline_mode<synchronous>, transform_indices = @transform_9, window_bounds = array<i64: 128, 1>}, {pipeline_mode = #tpu.pipeline_mode<synchronous>, transform_indices = @transform_10, window_bounds = array<i64: 128, 4>}, {pipeline_mode = #tpu.pipeline_mode<synchronous>, transform_indices = @transform_11, window_bounds = array<i64: 128, 1>}, {transform_indices = @transform_12, window_bounds = array<i64: 1, 256, 128>}, {transform_indices = @transform_13, window_bounds = array<i64: 1, 128, 256>}, {transform_indices = @transform_14, window_bounds = array<i64: 1, 128, 256>}]} {
    %c0 = arith.constant 0 : index
    %c0_0 = arith.constant 0 : index
    %c0_1 = arith.constant 0 : index
    %0 = vector.load %arg2[%c0, %c0_0, %c0_1] : memref<1x4x256xf32, #tpu.memory_space<vmem>>, vector<1x4x256xf32>
    %1 = vector.shape_cast %0 : vector<1x4x256xf32> to vector<4x256xf32>
    %c0_2 = arith.constant 0 : index
    %c0_3 = arith.constant 0 : index
    %c0_4 = arith.constant 0 : index
    %2 = vector.load %arg3[%c0_2, %c0_3, %c0_4] : memref<1x4x256xf32, #tpu.memory_space<vmem>>, vector<1x4x256xf32>
    %3 = vector.shape_cast %2 : vector<1x4x256xf32> to vector<4x256xf32>
    %c0_5 = arith.constant 0 : index
    %c0_6 = arith.constant 0 : index
    %4 = vector.load %arg4[%c0_5, %c0_6] : memref<128x4xf32, #tpu.memory_space<vmem>>, vector<128x4xf32>
    %cst = arith.constant dense<0.000000e+00> : vector<128x256xf32>
    %5 = tpu.matmul %4, %1, %cst {dimension_numbers = #tpu.dot_dimension_numbers<[1], [0], [0], [1], [0, 0, 1, 1], [], []>} : vector<128x4xf32>, vector<4x256xf32>, vector<128x256xf32> -> vector<128x256xf32>
    %c0_7 = arith.constant 0 : index
    %c0_8 = arith.constant 0 : index
    %6 = vector.load %arg5[%c0_7, %c0_8] : memref<128x1xf32, #tpu.memory_space<vmem>>, vector<128x1xf32>
    %7 = vector.broadcast %6 : vector<128x1xf32> to vector<128x256xf32>
    %8 = arith.addf %5, %7 : vector<128x256xf32>
    %cst_9 = arith.constant 0.000000e+00 : f32
    %9 = vector.broadcast %cst_9 : f32 to vector<128x256xf32>
    %10 = arith.maximumf %8, %9 : vector<128x256xf32>
    %c0_10 = arith.constant 0 : index
    %c0_11 = arith.constant 0 : index
    %11 = vector.load %arg6[%c0_10, %c0_11] : memref<128x128xf32, #tpu.memory_space<vmem>>, vector<128x128xf32>
    %cst_12 = arith.constant dense<0.000000e+00> : vector<128x256xf32>
    %12 = tpu.matmul %11, %10, %cst_12 {dimension_numbers = #tpu.dot_dimension_numbers<[1], [0], [0], [1], [0, 0, 1, 1], [], []>} : vector<128x128xf32>, vector<128x256xf32>, vector<128x256xf32> -> vector<128x256xf32>
    %c0_13 = arith.constant 0 : index
    %c0_14 = arith.constant 0 : index
    %13 = vector.load %arg7[%c0_13, %c0_14] : memref<128x1xf32, #tpu.memory_space<vmem>>, vector<128x1xf32>
    %14 = vector.broadcast %13 : vector<128x1xf32> to vector<128x256xf32>
    %15 = arith.addf %12, %14 : vector<128x256xf32>
    %cst_15 = arith.constant 0.000000e+00 : f32
    %16 = vector.broadcast %cst_15 : f32 to vector<128x256xf32>
    %17 = arith.maximumf %15, %16 : vector<128x256xf32>
    %c0_16 = arith.constant 0 : index
    %c0_17 = arith.constant 0 : index
    %18 = vector.load %arg8[%c0_16, %c0_17] : memref<128x4xf32, #tpu.memory_space<vmem>>, vector<128x4xf32>
    %cst_18 = arith.constant dense<0.000000e+00> : vector<128x256xf32>
    %19 = tpu.matmul %18, %3, %cst_18 {dimension_numbers = #tpu.dot_dimension_numbers<[1], [0], [0], [1], [0, 0, 1, 1], [], []>} : vector<128x4xf32>, vector<4x256xf32>, vector<128x256xf32> -> vector<128x256xf32>
    %c0_19 = arith.constant 0 : index
    %c0_20 = arith.constant 0 : index
    %20 = vector.load %arg9[%c0_19, %c0_20] : memref<128x1xf32, #tpu.memory_space<vmem>>, vector<128x1xf32>
    %21 = vector.broadcast %20 : vector<128x1xf32> to vector<128x256xf32>
    %22 = arith.addf %19, %21 : vector<128x256xf32>
    %cst_21 = arith.constant 0.000000e+00 : f32
    %23 = vector.broadcast %cst_21 : f32 to vector<128x256xf32>
    %24 = arith.maximumf %22, %23 : vector<128x256xf32>
    %c0_22 = arith.constant 0 : index
    %c0_23 = arith.constant 0 : index
    %25 = vector.load %arg10[%c0_22, %c0_23] : memref<128x128xf32, #tpu.memory_space<vmem>>, vector<128x128xf32>
    %cst_24 = arith.constant dense<0.000000e+00> : vector<128x256xf32>
    %26 = tpu.matmul %25, %24, %cst_24 {dimension_numbers = #tpu.dot_dimension_numbers<[1], [0], [0], [1], [0, 0, 1, 1], [], []>} : vector<128x128xf32>, vector<128x256xf32>, vector<128x256xf32> -> vector<128x256xf32>
    %c0_25 = arith.constant 0 : index
    %c0_26 = arith.constant 0 : index
    %27 = vector.load %arg11[%c0_25, %c0_26] : memref<128x1xf32, #tpu.memory_space<vmem>>, vector<128x1xf32>
    %28 = vector.broadcast %27 : vector<128x1xf32> to vector<128x256xf32>
    %29 = arith.addf %26, %28 : vector<128x256xf32>
    %cst_27 = arith.constant 0.000000e+00 : f32
    %30 = vector.broadcast %cst_27 : f32 to vector<128x256xf32>
    %31 = arith.maximumf %29, %30 : vector<128x256xf32>
    %c0_28 = arith.constant 0 : index
    %c0_29 = arith.constant 0 : index
    %32 = vector.load %arg12[%c0_28, %c0_29] : memref<128x4xf32, #tpu.memory_space<vmem>>, vector<128x4xf32>
    %cst_30 = arith.constant dense<0.000000e+00> : vector<128x256xf32>
    %33 = tpu.matmul %32, %3, %cst_30 {dimension_numbers = #tpu.dot_dimension_numbers<[1], [0], [0], [1], [0, 0, 1, 1], [], []>} : vector<128x4xf32>, vector<4x256xf32>, vector<128x256xf32> -> vector<128x256xf32>
    %c0_31 = arith.constant 0 : index
    %c0_32 = arith.constant 0 : index
    %34 = vector.load %arg13[%c0_31, %c0_32] : memref<128x1xf32, #tpu.memory_space<vmem>>, vector<128x1xf32>
    %35 = vector.broadcast %34 : vector<128x1xf32> to vector<128x256xf32>
    %36 = arith.addf %33, %35 : vector<128x256xf32>
    %cst_33 = arith.constant 0.000000e+00 : f32
    %37 = vector.broadcast %cst_33 : f32 to vector<128x256xf32>
    %38 = arith.maximumf %36, %37 : vector<128x256xf32>
    %39 = tpu.transpose %17, [1, 0] : vector<128x256xf32> -> vector<256x128xf32>
    %40 = arith.truncf %39 : vector<256x128xf32> to vector<256x128xbf16>
    %c0_34 = arith.constant 0 : index
    %c0_35 = arith.constant 0 : index
    %c0_36 = arith.constant 0 : index
    %41 = vector.load %arg14[%c0_34, %c0_35, %c0_36] : memref<1x256x128xbf16, #tpu.memory_space<vmem>>, vector<1x256x128xbf16>
    %42 = vector.shape_cast %41 : vector<1x256x128xbf16> to vector<256x128xbf16>
    %43 = vector.shape_cast %40 : vector<256x128xbf16> to vector<1x256x128xbf16>
    tpu.vector_store %arg14[%c0_34, %c0_35, %c0_36], %43 {strides = array<i32>} : memref<1x256x128xbf16, #tpu.memory_space<vmem>>, vector<1x256x128xbf16>,
    %44 = arith.truncf %31 : vector<128x256xf32> to vector<128x256xbf16>
    %c0_37 = arith.constant 0 : index
    %c0_38 = arith.constant 0 : index
    %c0_39 = arith.constant 0 : index
    %45 = vector.load %arg15[%c0_37, %c0_38, %c0_39] : memref<1x128x256xbf16, #tpu.memory_space<vmem>>, vector<1x128x256xbf16>
    %46 = vector.shape_cast %45 : vector<1x128x256xbf16> to vector<128x256xbf16>
    %47 = vector.shape_cast %44 : vector<128x256xbf16> to vector<1x128x256xbf16>
    tpu.vector_store %arg15[%c0_37, %c0_38, %c0_39], %47 {strides = array<i32>} : memref<1x128x256xbf16, #tpu.memory_space<vmem>>, vector<1x128x256xbf16>,
    %48 = arith.truncf %38 : vector<128x256xf32> to vector<128x256xbf16>
    %c0_40 = arith.constant 0 : index
    %c0_41 = arith.constant 0 : index
    %c0_42 = arith.constant 0 : index
    %49 = vector.load %arg16[%c0_40, %c0_41, %c0_42] : memref<1x128x256xbf16, #tpu.memory_space<vmem>>, vector<1x128x256xbf16>
    %50 = vector.shape_cast %49 : vector<1x128x256xbf16> to vector<128x256xbf16>
    %51 = vector.shape_cast %48 : vector<128x256xbf16> to vector<1x128x256xbf16>
    tpu.vector_store %arg16[%c0_40, %c0_41, %c0_42], %51 {strides = array<i32>} : memref<1x128x256xbf16, #tpu.memory_space<vmem>>, vector<1x128x256xbf16>,
    return
  }
  func.func @transform_0(%arg0: i32, %arg1: i32) -> (i32, i32, i32) {
    %c0_i32 = arith.constant 0 : i32
    %c0_i32_0 = arith.constant 0 : i32
    return %arg0, %c0_i32, %arg1 : i32, i32, i32
  }
  func.func @transform_1(%arg0: i32, %arg1: i32) -> (i32, i32, i32) {
    %c0_i32 = arith.constant 0 : i32
    %c0_i32_0 = arith.constant 0 : i32
    return %arg0, %c0_i32, %arg1 : i32, i32, i32
  }
  func.func @transform_2(%arg0: i32, %arg1: i32) -> (i32, i32) {
    %c0_i32 = arith.constant 0 : i32
    %c0_i32_0 = arith.constant 0 : i32
    %c0_i32_1 = arith.constant 0 : i32
    return %c0_i32, %c0_i32_0 : i32, i32
  }
  func.func @transform_3(%arg0: i32, %arg1: i32) -> (i32, i32) {
    %c0_i32 = arith.constant 0 : i32
    %c0_i32_0 = arith.constant 0 : i32
    %c0_i32_1 = arith.constant 0 : i32
    return %c0_i32, %c0_i32_0 : i32, i32
  }
  func.func @transform_4(%arg0: i32, %arg1: i32) -> (i32, i32) {
    %c0_i32 = arith.constant 0 : i32
    %c0_i32_0 = arith.constant 0 : i32
    %c0_i32_1 = arith.constant 0 : i32
    return %c0_i32, %c0_i32_0 : i32, i32
  }
  func.func @transform_5(%arg0: i32, %arg1: i32) -> (i32, i32) {
    %c0_i32 = arith.constant 0 : i32
    %c0_i32_0 = arith.constant 0 : i32
    %c0_i32_1 = arith.constant 0 : i32
    return %c0_i32, %c0_i32_0 : i32, i32
  }
  func.func @transform_6(%arg0: i32, %arg1: i32) -> (i32, i32) {
    %c0_i32 = arith.constant 0 : i32
    %c0_i32_0 = arith.constant 0 : i32
    %c0_i32_1 = arith.constant 0 : i32
    return %c0_i32, %c0_i32_0 : i32, i32
  }
  func.func @transform_7(%arg0: i32, %arg1: i32) -> (i32, i32) {
    %c0_i32 = arith.constant 0 : i32
    %c0_i32_0 = arith.constant 0 : i32
    %c0_i32_1 = arith.constant 0 : i32
    return %c0_i32, %c0_i32_0 : i32, i32
  }
  func.func @transform_8(%arg0: i32, %arg1: i32) -> (i32, i32) {
    %c0_i32 = arith.constant 0 : i32
    %c0_i32_0 = arith.constant 0 : i32
    %c0_i32_1 = arith.constant 0 : i32
    return %c0_i32, %c0_i32_0 : i32, i32
  }
  func.func @transform_9(%arg0: i32, %arg1: i32) -> (i32, i32) {
    %c0_i32 = arith.constant 0 : i32
    %c0_i32_0 = arith.constant 0 : i32
    %c0_i32_1 = arith.constant 0 : i32
    return %c0_i32, %c0_i32_0 : i32, i32
  }
  func.func @transform_10(%arg0: i32, %arg1: i32) -> (i32, i32) {
    %c0_i32 = arith.constant 0 : i32
    %c0_i32_0 = arith.constant 0 : i32
    %c0_i32_1 = arith.constant 0 : i32
    return %c0_i32, %c0_i32_0 : i32, i32
  }
  func.func @transform_11(%arg0: i32, %arg1: i32) -> (i32, i32) {
    %c0_i32 = arith.constant 0 : i32
    %c0_i32_0 = arith.constant 0 : i32
    %c0_i32_1 = arith.constant 0 : i32
    return %c0_i32, %c0_i32_0 : i32, i32
  }
  func.func @transform_12(%arg0: i32, %arg1: i32) -> (i32, i32, i32) {
    %c0_i32 = arith.constant 0 : i32
    %c0_i32_0 = arith.constant 0 : i32
    return %arg0, %arg1, %c0_i32 : i32, i32, i32
  }
  func.func @transform_13(%arg0: i32, %arg1: i32) -> (i32, i32, i32) {
    %c0_i32 = arith.constant 0 : i32
    %c0_i32_0 = arith.constant 0 : i32
    return %arg0, %c0_i32, %arg1 : i32, i32, i32
  }
  func.func @transform_14(%arg0: i32, %arg1: i32) -> (i32, i32, i32) {
    %c0_i32 = arith.constant 0 : i32
    %c0_i32_0 = arith.constant 0 : i32
    return %arg0, %c0_i32, %arg1 : i32, i32, i32
  }
}

</mosaic_0001>

<bundles_post_ra>
// kernel: tpu_custom_call.1
= control target key start
LH: loop header
LB: loop body
LE: loop exit
PB: predicated region body
PF: predicated region fallthrough
CT: control target
= control target key end

     0   :  { %s4857_s0 = inlined_call_operand.vmem [shape: f32[2,4,256], index: 0, kind: input, shape index: {}]   ;;  %s4858_s1 = inlined_call_operand.vmem [shape: f32[2,4,256], index: 1, kind: input, shape index: {}]   ;;  %s4859_s2 = inlined_call_operand.vmem [shape: f32[128,4], index: 2, kind: input, shape index: {}]   ;;  %s4860_s3 = inlined_call_operand.vmem [shape: f32[128,1], index: 3, kind: input, shape index: {}]   ;;  %s4861_s4 = inlined_call_operand.vmem [shape: f32[128,128], index: 4, kind: input, shape index: {}]   ;;  %s4862_s5 = inlined_call_operand.vmem [shape: f32[128,1], index: 5, kind: input, shape index: {}]   ;;  %s4863_s6 = inlined_call_operand.vmem [shape: f32[128,4], index: 6, kind: input, shape index: {}]   ;;  %s4864_s7 = inlined_call_operand.vmem [shape: f32[128,1], index: 7, kind: input, shape index: {}]   ;;  %s4865_s8 = inlined_call_operand.vmem [shape: f32[128,128], index: 8, kind: input, shape index: {}]   ;;  %s4866_s9 = inlined_call_operand.vmem [shape: f32[128,1], index: 9, kind: input, shape index: {}]   ;;  %s4867_s10 = inlined_call_operand.vmem [shape: f32[128,4], index: 10, kind: input, shape index: {}]   ;;  %s4868_s11 = inlined_call_operand.vmem [shape: f32[128,1], index: 11, kind: input, shape index: {}]   ;;  %s4869_s12 = inlined_call_operand.hbm [shape: bf16[2,256,128], index: 12, kind: output, shape index: {0}]   ;;  %s4870_s13 = inlined_call_operand.hbm [shape: bf16[2,128,256], index: 13, kind: output, shape index: {1}]   ;;  %s4871_s14 = inlined_call_operand.hbm [shape: bf16[2,128,256], index: 14, kind: output, shape index: {2}]  }
   0x1   :  { %4880 = sst [smem:[#allocation15_spill]] %s4857_s0 }
   0x2   :  { %4881 = sst [smem:[#allocation16_spill]] %s4858_s1 }
   0x3   :  { %20 = vsyncpa [#allocation3], 0 }
   0x4   :  { %22 = vsyncpa [#allocation3 + $0x1], 0 }
   0x5   :  { %23 = vsyncpa [#allocation5], 0 }
   0x6   :  { %25 = vsyncpa [#allocation5 + $0x1], 0  ;;  %s3698_s29 = smov 0   ;;  %s3700_s30 = smov 0  }
   0x7   :  { %s3702_s15 = smov 0   ;;  %s3704_s16 = smov 0  }
   0x8   :  { %s3706_s17 = smov 0   ;;  %s3708_s18 = smov 0  }
   0x9 LB: > { %4882 = sst [smem:[#allocation9_spill]] %s3592_s29  ;;  %s4872_s19 = sadd.s32 4294967295, %s3612_s18   ;;  %s3612_s18 = sphi %s3708_s18, %s31_s18   ;;  %s3608_s17 = sphi %s3706_s17, %s4902_s17   ;;  %s3604_s16 = sphi %s3704_s16, %s4901_s16   ;;  %s3600_s15 = sphi %s3702_s15, %s4900_s15   ;;  %s3596_s30 = sphi %s3700_s30, %s4904_s30   ;;  %s3592_s29 = sphi %s3698_s29, %s4903_s29  }
   0xa   : > { %4883 = sst [smem:[#allocation10_spill]] %s3600_s15  ;;  %s4873_s20 = sadd.s32 4294967294, %s3612_s18  }
   0xb   : > { %4884 = sst [smem:[#allocation11_spill]] %s3608_s17  ;;  %s43_s21 = sadd.s32 1, %s3608_s17 }
   0xc   : > { %s318_s22 = sadd.s32 1, %s3600_s15  ;;  %p45_p0 = scmp.ge.s32.totalorder %s43_s21, 2 }
   0xd   : > { %p328_p1 = scmp.ne.s32.totalorder %s3600_s15, %s3596_s30  ;;  %p329_p2 = scmp.eq.s32.totalorder %s4872_s19, 1 }
   0xe   : > { %p334_p3 = scmp.ne.s32.totalorder %s3596_s30, %s3592_s29  ;;  %s4906_s21 = smov (%p45_p0, %s43_s21), 0 }
   0xf   : > { %4885 = sst [smem:[#allocation12_spill]] %s4906_s21  ;;  %p3740_p4 = por %p329_p2, %p328_p1 }
  0x10   : > { %p335_p5 = scmp.eq.s32.totalorder %s4873_s20, 1  ;;  %s313_s24 = ssub.s32 %s3608_s17, %s4906_s21 }
  0x11   : > { %p2920_p6 = scmp.ge.s32.totalorder %s3612_s18, 1  ;;  %p316_p7 = scmp.eq.s32.totalorder %s313_s24, 0 }
  0x12   : > { %p3749_p8 = por %p335_p5, %p334_p3  ;;  %p465_p9 = scmp.lt.s32.totalorder %s3612_s18, 3 }
  0x13   : > { %s3755_s26 = scalar_select %p316_p7, %s3600_s15, %s318_s22  }
  0x14   : > { %s4887_s25 = scalar_select %p3749_p8, 1, 0 }
  0x15   : > { %4889 = sst [smem:[#allocation14_spill]] %s3755_s26  ;;  %p466_p10 = pnand %p2920_p6, %p465_p9 }
  0x16   : > { %4888 = sst [smem:[#allocation13_spill]] %s4887_s25  ;;  %v577_v0 = vld [vmem:[%s4860_s3 + $0x10] sm:$0xff] (!%p466_p10)  ;;  %v575_v1 = vld [vmem:[%s4860_s3] sm:$0xff] (!%p466_p10)  ;;  %p535_p11 = scmp.lt.s32.totalorder (!%p466_p10), %s3604_s16, 1  ;;  %v3614_v2 = vmov (!%p466_p10), 0   ;;  %v578_v3 = vld [vmem:[%s4860_s3 + $0x18] sm:$0xff] (!%p466_p10) }
  0x17   : > { %469 = sbr.rel (%p466_p10) target bundleno = 766 (0x2fe), region = 68  ;;  %3359 = vset.pattern.permute.xlu1 (!%p466_p10), %v3614_v2  ;;  %3358 = vset.pattern.permute.xlu0 (!%p466_p10), %v3614_v2  ;;  %v576_v4 = vld [vmem:[%s4860_s3 + $0x8] sm:$0xff] (!%p466_p10)  ;;  %v3615_v5 = vmov (!%p466_p10), 0.0   ;;  %s4890_s0 = sld [smem:[#allocation15_spill]] (!%p466_p10)  ;;  %vm722_vm0 = vcmask (!%p466_p10), 1043456   ;;  %v579_v9 = vld [vmem:[%s4860_s3 + $0x20] sm:$0xff] (!%p466_p10) }
  0x18   : > { %603 = vperm.xlu1 (!%p466_p10), %3359, %v577_v0   ;;  %593 = vperm.xlu0 (!%p466_p10), %3358, %v575_v1   ;;  %s4891_s1 = sld [smem:[#allocation16_spill]] (!%p466_p10)  ;;  %v580_v8 = vld [vmem:[%s4860_s3 + $0x28] sm:$0xff] (!%p466_p10)  ;;  %v559_v11 = vld [vmem:[%s4859_s2] sm:$0xff] (!%p466_p10)  ;;  %vm673_vm1 = vcmask (!%p466_p10), 31744   ;;  %v582_v13 = vld [vmem:[%s4860_s3 + $0x38] sm:$0xff] (!%p466_p10)  ;;  %s4892_s15 = sadd.s32 (!%p466_p10), 4294967295, %s3612_s18  }
  0x19   : > { %791 = vmatprep.mubr.f32.mxu0 (!%p466_p10), %v3615_v5  ;;  %839 = vmatprep.mubr.f32.mxu1 (!%p466_p10), %v3615_v5  ;;  %v567_v12 = vld [vmem:[%s4859_s2 + $0x40] sm:$0xff] (!%p466_p10)  ;;  %v581_v14 = vld [vmem:[%s4860_s3 + $0x30] sm:$0xff] (!%p466_p10)  ;;  %v560_v16 = vld [vmem:[%s4859_s2 + $0x8] sm:$0xff] (!%p466_p10)  ;;  %s4700_s25 = sand.u32 (!%p466_p10), 1, %s4892_s15   ;;  %s3616_s28 = smov (!%p466_p10), [#allocation4]  }
  0x1a   : > { %v568_v17 = vld [vmem:[%s4859_s2 + $0x48] sm:$0xff] (!%p466_p10)  ;;  %v583_v19 = vld [vmem:[%s4860_s3 + $0x40] sm:$0xff] (!%p466_p10)  ;;  %v561_v20 = vld [vmem:[%s4859_s2 + $0x10] sm:$0xff] (!%p466_p10)  ;;  %s3478_s21 = sshll.u32 (!%p466_p10), %s3616_s28, 4  ;;  %s3479_s21 = int_to_ptr.vmem [resolvable:$false] %s3478_s21 }
  0x1b   : > { %v584_v18 = vld [vmem:[%s4860_s3 + $0x48] sm:$0xff] (!%p466_p10)  ;;  %v569_v21 = vld [vmem:[%s4859_s2 + $0x50] sm:$0xff] (!%p466_p10)  ;;  %v586_v22 = vld [vmem:[%s4860_s3 + $0x58] sm:$0xff] (!%p466_p10) }
  0x1c   : > { %608 = vperm.xlu1 (!%p466_p10), %3359, %v578_v3   ;;  %598 = vperm.xlu0 (!%p466_p10), %3358, %v576_v4   ;;  %v585_v23 = vld [vmem:[%s4860_s3 + $0x50] sm:$0xff] (!%p466_p10)  ;;  %v562_v24 = vld [vmem:[%s4859_s2 + $0x18] sm:$0xff] (!%p466_p10)  ;;  %v588_v26 = vld [vmem:[%s4860_s3 + $0x68] sm:$0xff] (!%p466_p10) }
  0x1d   : > { %v570_v25 = vld [vmem:[%s4859_s2 + $0x58] sm:$0xff] (!%p466_p10)  ;;  %v587_v27 = vld [vmem:[%s4860_s3 + $0x60] sm:$0xff] (!%p466_p10)  ;;  %v589_v31 = vld [vmem:[%s4860_s3 + $0x70] sm:$0xff] (!%p466_p10) }
  0x1e   : > { %s536_s22 = scalar_select %p535_p11, %s3604_s16, 1  ;;  %v563_v28 = vld [vmem:[%s4859_s2 + $0x20] sm:$0xff]  ;;  %v590_v30 = vld [vmem:[%s4860_s3 + $0x78] sm:$0xff]  ;;  %v564_v32 = vld [vmem:[%s4859_s2 + $0x28] sm:$0xff] }
  0x1f   : > { %v571_v29 = vld [vmem:[%s4859_s2 + $0x60] sm:$0xff]  ;;  %v572_v33 = vld [vmem:[%s4859_s2 + $0x68] sm:$0xff]  ;;  %v565_v36 = vld [vmem:[%s4859_s2 + $0x30] sm:$0xff] }
  0x20   : > { %s3057_s19 = sshll.u32 %s536_s22, 3  ;;  %618 = vperm.xlu1 %3359, %v580_v8   ;;  %613 = vperm.xlu0 %3358, %v579_v9   ;;  %v1242_v34 = vld [vmem:[%s4864_s7 + $0x8] sm:$0xff]  ;;  %v1241_v35 = vld [vmem:[%s4864_s7] sm:$0xff]  ;;  %v573_v37 = vld [vmem:[%s4859_s2 + $0x70] sm:$0xff]  ;;  %s4704_s22 = sshll.u32 %s3604_s16, 11 }
  0x21   : > { %s542_s26 = scalar_lea.vmem %s4890_s0, %s3057_s19  ;;  %s552_s29 = scalar_lea.vmem %s4891_s1, %s3057_s19  ;;  %v1244_v38 = vld [vmem:[%s4864_s7 + $0x18] sm:$0xff]  ;;  %v1243_v39 = vld [vmem:[%s4864_s7 + $0x10] sm:$0xff]  ;;  %v1246_v42 = vld [vmem:[%s4864_s7 + $0x28] sm:$0xff] }
  0x22   : > { %v557_v6 = vld [vmem:[%s542_s26] sm:$0xff]  ;;  %v566_v40 = vld [vmem:[%s4859_s2 + $0x38] sm:$0xff]  ;;  %v1247_v46 = vld [vmem:[%s4864_s7 + $0x30] sm:$0xff]  ;;  %s4879_s26 = sand.u32 1, %s3596_s30   ;;  %s4713_s24 = scalar_lea.hbm %s4870_s13, %s4704_s22 }
  0x23   : > { %v672_v7 = vcombine.high %v557_v6, %v557_v6  ;;  %v3785_v10 = vld [vmem:[%s552_s29] sm:$0xff]  ;;  %v574_v41 = vld [vmem:[%s4859_s2 + $0x78] sm:$0xff]  ;;  %v1226_v47 = vld [vmem:[%s4863_s6 + $0x8] sm:$0xff]  ;;  %s4517_s19 = sshll.u32 %s4879_s26, 7  ;;  %s4721_s16 = scalar_lea.hbm %s4871_s14, %s4704_s22 }
  0x24   : > { %v1338_v15 = vcombine.high %v3785_v10, %v3785_v10  ;;  %628 = vperm.xlu1 %3359, %v582_v13   ;;  %623 = vperm.xlu0 %3358, %v581_v14   ;;  %v1245_v43 = vld [vmem:[%s4864_s7 + $0x20] sm:$0xff]  ;;  %v1248_v45 = vld [vmem:[%s4864_s7 + $0x38] sm:$0xff]  ;;  %v1250_v48 = vld [vmem:[%s4864_s7 + $0x48] sm:$0xff]  ;;  %s4524_s17 = scalar_lea.vmem [#allocation6], %s4517_s19  ;;  %s4655_s27 = scalar_lea.vmem [#allocation4], %s4517_s19 }
  0x25   : > { %2928 = vmatprep.subr.msk.mxu0 %vm722_vm0, %v672_v7  ;;  %3285 = vmatprep.subr.msk.mxu1 %vm722_vm0, %v672_v7  ;;  %v1225_v44 = vld [vmem:[%s4863_s6] sm:$0xff]  ;;  %v1227_v50 = vld [vmem:[%s4863_s6 + $0x10] sm:$0xff]  ;;  %v1252_v51 = vld [vmem:[%s4864_s7 + $0x58] sm:$0xff]  ;;  %s2734_s29 = sshll.u32 %s4655_s27, 4  ;;  %s2752_s20 = sshll.u32 %s4524_s17, 4  ;;  %s4715_s29 = int_to_ptr.vmem [resolvable:$true] %s2734_s29  ;;  %s4723_s20 = int_to_ptr.vmem [resolvable:$true] %s2752_s20 }
  0x26   : > { %2929 = vmatpush1.msk.msra.mxu0 %vm722_vm0, %v557_v6  ;;  %3286 = vmatpush1.msk.msra.mxu1 %vm722_vm0, %v557_v6  ;;  %v1249_v49 = vld [vmem:[%s4864_s7 + $0x40] sm:$0xff]  ;;  %v1251_v52 = vld [vmem:[%s4864_s7 + $0x50] sm:$0xff]  ;;  %v1228_v53 = vld [vmem:[%s4863_s6 + $0x18] sm:$0xff]  ;;  %s3474_s0 = scalar_lea.vmem %s4715_s29, 2048  ;;  %s3480_s1 = scalar_lea.vmem %s3479_s21, 4096 }
  0x27   : > { %2930 = vmatmul.mubr.msk.f32.vlgmr.msra.gmra.mrb[0].mxu0 %vm673_vm1, %v559_v11  ;;  %2938 = vmatmul.mubr.msk.f32.vlgmr.msra.gmra.mrb[0].mxu1 %vm673_vm1, %v567_v12  ;;  %v1254_v54 = vld [vmem:[%s4864_s7 + $0x68] sm:$0xff]  ;;  %v1253_v55 = vld [vmem:[%s4864_s7 + $0x60] sm:$0xff]  ;;  %v1256_v57 = vld [vmem:[%s4864_s7 + $0x78] sm:$0xff]  ;;  %p3475_p12 = scmp.ne.s32.totalorder %s4715_s29, %s3474_s0  ;;  %p3481_p1 = scmp.lt.s32.totalorder %s4715_s29, %s3479_s21 }
  0x28   : > { %797 = vmatprep.mubr.f32.mxu0 %v3615_v5  ;;  %845 = vmatprep.mubr.f32.mxu1 %v3615_v5  ;;  %v1229_v56 = vld [vmem:[%s4863_s6 + $0x20] sm:$0xff]  ;;  %v1255_v58 = vld [vmem:[%s4864_s7 + $0x70] sm:$0xff]  ;;  %v1230_v59 = vld [vmem:[%s4863_s6 + $0x28] sm:$0xff]  ;;  %p3482_p2 = scmp.lt.s32.totalorder %s3480_s1, %s3474_s0 }
  0x29   : > { %2946 = vmatprep.subr.msk.mxu0 %vm722_vm0, %v1338_v15  ;;  %638 = vperm.xlu1 %3359, %v584_v18   ;;  %v937_v60 = vld [vmem:[%s4862_s5 + $0x8] sm:$0xff]  ;;  %v936_v61 = vld [vmem:[%s4862_s5] sm:$0xff]  ;;  %v1231_v62 = vld [vmem:[%s4863_s6 + $0x30] sm:$0xff]  ;;  %p3476_p13 = pnand %p3475_p12, %p3740_p4 }
  0x2a   : > { %633 = vperm.xlu0 %3358, %v583_v19   ;;  %2947 = vmatpush1.msk.msra.mxu0 %vm722_vm0, %v3785_v10  ;;  %v939_v63 = vld [vmem:[%s4862_s5 + $0x18] sm:$0xff]  ;;  %v938_v0 = vld [vmem:[%s4862_s5 + $0x10] sm:$0xff]  ;;  %v941_v2 = vld [vmem:[%s4862_s5 + $0x28] sm:$0xff]  ;;  %p3483_p3 = por %p3482_p2, %p3481_p1 }
  0x2b   : > { %2931 = vmatmul.mubr.msk.f32.gmra.mrb[2].mxu0 %vm673_vm1, %v560_v16  ;;  %2939 = vmatmul.mubr.msk.f32.gmra.mrb[2].mxu1 %vm673_vm1, %v568_v17  ;;  %v1232_v1 = vld [vmem:[%s4863_s6 + $0x38] sm:$0xff]  ;;  %v940_v3 = vld [vmem:[%s4862_s5 + $0x20] sm:$0xff]  ;;  %v942_v7 = vld [vmem:[%s4862_s5 + $0x30] sm:$0xff]  ;;  %p3477_p0 = pneg %p3476_p13 }
  0x2c   : > { %803 = vmatprep.mubr.f32.mxu0 %v3615_v5  ;;  %851 = vmatprep.mubr.f32.mxu1 %v3615_v5  ;;  %v1233_v4 = vld [vmem:[%s4863_s6 + $0x40] sm:$0xff]  ;;  %v943_v6 = vld [vmem:[%s4862_s5 + $0x38] sm:$0xff]  ;;  %v1234_v8 = vld [vmem:[%s4863_s6 + $0x48] sm:$0xff] }
  0x2d   : > { %648 = vperm.xlu1 %3359, %v586_v22   ;;  %2964 = vmatprep.subr.msk.mxu0 %vm722_vm0, %v1338_v15  ;;  %v945_v9 = vld [vmem:[%s4862_s5 + $0x48] sm:$0xff]  ;;  %v1235_v11 = vld [vmem:[%s4863_s6 + $0x50] sm:$0xff]  ;;  %v947_v12 = vld [vmem:[%s4862_s5 + $0x58] sm:$0xff]  ;;  %p3484_p5 = pnand %p3483_p3, %p3477_p0 }
  0x2e   : > { %643 = vperm.xlu0 %3358, %v585_v23   ;;  %v946_v13 = vld [vmem:[%s4862_s5 + $0x50] sm:$0xff]  ;;  %v1236_v14 = vld [vmem:[%s4863_s6 + $0x58] sm:$0xff]  ;;  %v949_v15 = vld [vmem:[%s4862_s5 + $0x68] sm:$0xff] }
  0x2f   : > { %2932 = vmatmul.mubr.msk.f32.gmra.mrb[4].mxu0 %vm673_vm1, %v561_v20  ;;  %2940 = vmatmul.mubr.msk.f32.gmra.mrb[4].mxu1 %vm673_vm1, %v569_v21  ;;  %v948_v16 = vld [vmem:[%s4862_s5 + $0x60] sm:$0xff]  ;;  %v951_v18 = vld [vmem:[%s4862_s5 + $0x78] sm:$0xff]  ;;  %v950_v19 = vld [vmem:[%s4862_s5 + $0x70] sm:$0xff] }
  0x30   : > { %809 = vmatprep.mubr.f32.mxu0 %v3615_v5  ;;  %857 = vmatprep.mubr.f32.mxu1 %v3615_v5  ;;  %v1237_v17 = vld [vmem:[%s4863_s6 + $0x60] sm:$0xff]  ;;  %v1238_v20 = vld [vmem:[%s4863_s6 + $0x68] sm:$0xff]  ;;  %v1239_v23 = vld [vmem:[%s4863_s6 + $0x70] sm:$0xff] }
  0x31   : > { %658 = vperm.xlu1 %3359, %v588_v26   ;;  %v1601_v21 = vld [vmem:[%s4866_s9 + $0x8] sm:$0xff]  ;;  %v1600_v22 = vld [vmem:[%s4866_s9] sm:$0xff]  ;;  %v1240_v26 = vld [vmem:[%s4863_s6 + $0x78] sm:$0xff] }
  0x32   : > { %653 = vperm.xlu0 %3358, %v587_v27   ;;  %v1605_v27 = vld [vmem:[%s4866_s9 + $0x28] sm:$0xff] }
  0x33   : > { %2933 = vmatmul.mubr.msk.f32.gmra.mrb[6].mxu0 %vm673_vm1, %v562_v24  ;;  %2941 = vmatmul.mubr.msk.f32.gmra.mrb[6].mxu1 %vm673_vm1, %v570_v25  ;;  %v1603_v24 = vld [vmem:[%s4866_s9 + $0x18] sm:$0xff]  ;;  %v1602_v25 = vld [vmem:[%s4866_s9 + $0x10] sm:$0xff] }
  0x34   : > { %815 = vmatprep.mubr.f32.mxu0 %v3615_v5  ;;  %863 = vmatprep.mubr.f32.mxu1 %v3615_v5 }
  0x35   : > { %668 = vperm.xlu1 %3359, %v590_v30   ;;  %v1607_v30 = vld [vmem:[%s4866_s9 + $0x38] sm:$0xff] }
  0x36   : > { %663 = vperm.xlu0 %3358, %v589_v31   ;;  %v1606_v31 = vld [vmem:[%s4866_s9 + $0x30] sm:$0xff] }
  0x37   : > { %2934 = vmatmul.mubr.msk.f32.gmra.mrb[8].mxu0 %vm673_vm1, %v563_v28  ;;  %2942 = vmatmul.mubr.msk.f32.gmra.mrb[8].mxu1 %vm673_vm1, %v571_v29  ;;  %v1604_v28 = vld [vmem:[%s4866_s9 + $0x20] sm:$0xff] }
  0x38   : > { %821 = vmatprep.mubr.f32.mxu0 %v3615_v5  ;;  %869 = vmatprep.mubr.f32.mxu1 %v3615_v5  ;;  %v1889_v29 = vld [vmem:[%s4867_s10] sm:$0xff] }
  0x39   : > { %1264 = vperm.xlu1 %3359, %v1242_v34   ;;  %v1608_v34 = vld [vmem:[%s4866_s9 + $0x40] sm:$0xff] }
  0x3a   : > { %1259 = vperm.xlu0 %3358, %v1241_v35   ;;  %v1891_v35 = vld [vmem:[%s4867_s10 + $0x10] sm:$0xff] }
  0x3b   : > { %2935 = vmatmul.mubr.msk.f32.gmra.mrb[10].mxu0 %vm673_vm1, %v564_v32  ;;  %2943 = vmatmul.mubr.msk.f32.gmra.mrb[10].mxu1 %vm673_vm1, %v572_v33  ;;  %v1890_v32 = vld [vmem:[%s4867_s10 + $0x8] sm:$0xff] }
  0x3c   : > { %827 = vmatprep.mubr.f32.mxu0 %v3615_v5  ;;  %875 = vmatprep.mubr.f32.mxu1 %v3615_v5  ;;  %v1609_v33 = vld [vmem:[%s4866_s9 + $0x48] sm:$0xff] }
  0x3d   : > { %1274 = vperm.xlu1 %3359, %v1244_v38   ;;  %v1892_v38 = vld [vmem:[%s4867_s10 + $0x18] sm:$0xff] }
  0x3e   : > { %1269 = vperm.xlu0 %3358, %v1243_v39   ;;  %v1613_v39 = vld [vmem:[%s4866_s9 + $0x68] sm:$0xff] }
  0x3f   : > { %2936 = vmatmul.mubr.msk.f32.gmra.mrb[12].mxu0 %vm673_vm1, %v565_v36  ;;  %2944 = vmatmul.mubr.msk.f32.gmra.mrb[12].mxu1 %vm673_vm1, %v573_v37  ;;  %v1611_v36 = vld [vmem:[%s4866_s9 + $0x58] sm:$0xff]  ;;  %v1610_v37 = vld [vmem:[%s4866_s9 + $0x50] sm:$0xff] }
  0x40   : > { %833 = vmatprep.mubr.f32.mxu0 %v3615_v5  ;;  %881 = vmatprep.mubr.f32.mxu1 %v3615_v5 }
  0x41   : > { %1284 = vperm.xlu1 %3359, %v1246_v42   ;;  %v1615_v42 = vld [vmem:[%s4866_s9 + $0x78] sm:$0xff] }
  0x42   : > { %1279 = vperm.xlu0 %3358, %v1245_v43   ;;  %v1614_v43 = vld [vmem:[%s4866_s9 + $0x70] sm:$0xff] }
  0x43   : > { %2937 = vmatmul.mubr.msk.f32.gmra.mrb[14].mxu0 %vm673_vm1, %v566_v40  ;;  %2945 = vmatmul.mubr.msk.f32.gmra.mrb[14].mxu1 %vm673_vm1, %v574_v41  ;;  %v1612_v40 = vld [vmem:[%s4866_s9 + $0x60] sm:$0xff] }
  0x44   : > { %1455 = vmatprep.mubr.f32.mxu0 %v3615_v5  ;;  %1096 = vmatprep.mubr.f32.mxu1 %v3615_v5  ;;  %v1893_v41 = vld [vmem:[%s4867_s10 + $0x20] sm:$0xff] }
  0x45   : > { %1294 = vperm.xlu1 %3359, %v1248_v45   ;;  %v1906_v45 = vld [vmem:[%s4868_s11 + $0x8] sm:$0xff] }
  0x46   : > { %1289 = vperm.xlu0 %3358, %v1247_v46   ;;  %v1905_v46 = vld [vmem:[%s4868_s11] sm:$0xff] }
  0x47   : > { %2948 = vmatmul.mubr.msk.f32.vlgmr.msra.gmra.mrb[16].mxu0 %vm673_vm1, %v1225_v44  ;;  %v1894_v44 = vld [vmem:[%s4867_s10 + $0x28] sm:$0xff] }
  0x48   : > { %1461 = vmatprep.mubr.f32.mxu0 %v3615_v5  ;;  %2965 = vmatpush1.msk.msra.mxu0 %vm722_vm0, %v3785_v10  ;;  %v944_v10 = vld [vmem:[%s4862_s5 + $0x40] sm:$0xff] }
  0x49   : > { %1304 = vperm.xlu1 %3359, %v1250_v48  }
  0x4a   : > { %1299 = vperm.xlu0 %3358, %v1249_v49   ;;  %v1895_v49 = vld [vmem:[%s4867_s10 + $0x30] sm:$0xff] }
  0x4b   : > { %2949 = vmatmul.mubr.msk.f32.gmra.mrb[18].mxu0 %vm673_vm1, %v1226_v47 }
  0x4c   : > { %1467 = vmatprep.mubr.f32.mxu0 %v3615_v5 }
  0x4d   : > { %1314 = vperm.xlu1 %3359, %v1252_v51   ;;  %v1907_v51 = vld [vmem:[%s4868_s11 + $0x10] sm:$0xff] }
  0x4e   : > { %1309 = vperm.xlu0 %3358, %v1251_v52  }
  0x4f   : > { %2950 = vmatmul.mubr.msk.f32.gmra.mrb[20].mxu0 %vm673_vm1, %v1227_v50  ;;  %v1908_v50 = vld [vmem:[%s4868_s11 + $0x18] sm:$0xff] }
  0x50   : > { %1473 = vmatprep.mubr.f32.mxu0 %v3615_v5 }
  0x51   : > { %1324 = vperm.xlu1 %3359, %v1254_v54   ;;  %v1896_v54 = vld [vmem:[%s4867_s10 + $0x38] sm:$0xff] }
  0x52   : > { %1319 = vperm.xlu0 %3358, %v1253_v55   ;;  %v1910_v55 = vld [vmem:[%s4868_s11 + $0x28] sm:$0xff] }
  0x53   : > { %2951 = vmatmul.mubr.msk.f32.gmra.mrb[22].mxu0 %vm673_vm1, %v1228_v53 }
  0x54   : > { %1479 = vmatprep.mubr.f32.mxu0 %v3615_v5 }
  0x55   : > { %1334 = vperm.xlu1 %3359, %v1256_v57  }
  0x56   : > { %1329 = vperm.xlu0 %3358, %v1255_v58  }
  0x57   : > { %2952 = vmatmul.mubr.msk.f32.gmra.mrb[24].mxu0 %vm673_vm1, %v1229_v56  ;;  %v1909_v56 = vld [vmem:[%s4868_s11 + $0x20] sm:$0xff] }
  0x58   : > { %1485 = vmatprep.mubr.f32.mxu0 %v3615_v5 }
  0x59   : > { %959 = vperm.xlu1 %3359, %v937_v60   ;;  %v1912_v60 = vld [vmem:[%s4868_s11 + $0x38] sm:$0xff] }
  0x5a   : > { %954 = vperm.xlu0 %3358, %v936_v61   ;;  %v1911_v61 = vld [vmem:[%s4868_s11 + $0x30] sm:$0xff] }
  0x5b   : > { %2953 = vmatmul.mubr.msk.f32.gmra.mrb[26].mxu0 %vm673_vm1, %v1230_v59  ;;  %v1897_v59 = vld [vmem:[%s4867_s10 + $0x40] sm:$0xff] }
  0x5c   : > { %1491 = vmatprep.mubr.f32.mxu0 %v3615_v5 }
  0x5d   : > { %969 = vperm.xlu1 %3359, %v939_v63   ;;  %v1898_v63 = vld [vmem:[%s4867_s10 + $0x48] sm:$0xff] }
  0x5e   : > { %964 = vperm.xlu0 %3358, %v938_v0  }
  0x5f   : > { %2954 = vmatmul.mubr.msk.f32.gmra.mrb[28].mxu0 %vm673_vm1, %v1231_v62 }
  0x60   : > { %1497 = vmatprep.mubr.f32.mxu0 %v3615_v5 }
  0x61   : > { %979 = vperm.xlu1 %3359, %v941_v2   ;;  %v1913_v2 = vld [vmem:[%s4868_s11 + $0x40] sm:$0xff] }
  0x62   : > { %974 = vperm.xlu0 %3358, %v940_v3  }
  0x63   : > { %2955 = vmatmul.mubr.msk.f32.gmra.mrb[30].mxu0 %vm673_vm1, %v1232_v1  ;;  %v1914_v1 = vld [vmem:[%s4868_s11 + $0x48] sm:$0xff] }
  0x64   : > { %1503 = vmatprep.mubr.f32.mxu0 %v3615_v5 }
  0x65   : > { %989 = vperm.xlu1 %3359, %v943_v6   ;;  %v1916_v6 = vld [vmem:[%s4868_s11 + $0x58] sm:$0xff] }
  0x66   : > { %984 = vperm.xlu0 %3358, %v942_v7   ;;  %v1915_v7 = vld [vmem:[%s4868_s11 + $0x50] sm:$0xff] }
  0x67   : > { %2956 = vmatmul.mubr.msk.f32.gmra.mrb[32].mxu0 %vm673_vm1, %v1233_v4  ;;  %v1899_v4 = vld [vmem:[%s4867_s10 + $0x50] sm:$0xff] }
  0x68   : > { %1509 = vmatprep.mubr.f32.mxu0 %v3615_v5 }
  0x69   : > { %999 = vperm.xlu1 %3359, %v945_v9   ;;  %v1900_v9 = vld [vmem:[%s4867_s10 + $0x58] sm:$0xff] }
  0x6a   : > { %994 = vperm.xlu0 %3358, %v944_v10  }
  0x6b   : > { %2957 = vmatmul.mubr.msk.f32.gmra.mrb[34].mxu0 %vm673_vm1, %v1234_v8 }
  0x6c   : > { %1515 = vmatprep.mubr.f32.mxu0 %v3615_v5 }
  0x6d   : > { %1009 = vperm.xlu1 %3359, %v947_v12   ;;  %v1917_v12 = vld [vmem:[%s4868_s11 + $0x60] sm:$0xff] }
  0x6e   : > { %1004 = vperm.xlu0 %3358, %v946_v13   ;;  %v1901_v13 = vld [vmem:[%s4867_s10 + $0x60] sm:$0xff] }
  0x6f   : > { %2958 = vmatmul.mubr.msk.f32.gmra.mrb[36].mxu0 %vm673_vm1, %v1235_v11  ;;  %v1918_v11 = vld [vmem:[%s4868_s11 + $0x68] sm:$0xff] }
  0x70   : > { %1521 = vmatprep.mubr.f32.mxu0 %v3615_v5 }
  0x71   : > { %1019 = vperm.xlu1 %3359, %v949_v15   ;;  %v1920_v15 = vld [vmem:[%s4868_s11 + $0x78] sm:$0xff] }
  0x72   : > { %1014 = vperm.xlu0 %3358, %v948_v16   ;;  %v1919_v16 = vld [vmem:[%s4868_s11 + $0x70] sm:$0xff] }
  0x73   : > { %2959 = vmatmul.mubr.msk.f32.gmra.mrb[38].mxu0 %vm673_vm1, %v1236_v14 }
  0x74   : > { %1527 = vmatprep.mubr.f32.mxu0 %v3615_v5 }
  0x75   : > { %1029 = vperm.xlu1 %3359, %v951_v18   ;;  %v1902_v18 = vld [vmem:[%s4867_s10 + $0x68] sm:$0xff] }
  0x76   : > { %1024 = vperm.xlu0 %3358, %v950_v19  }
  0x77   : > { %2960 = vmatmul.mubr.msk.f32.gmra.mrb[40].mxu0 %vm673_vm1, %v1237_v17 }
  0x78   : > { %1533 = vmatprep.mubr.f32.mxu0 %v3615_v5 }
  0x79   : > { %1623 = vperm.xlu1 %3359, %v1601_v21  }
  0x7a   : > { %1618 = vperm.xlu0 %3358, %v1600_v22   ;;  %v1904_v22 = vld [vmem:[%s4867_s10 + $0x78] sm:$0xff] }
  0x7b   : > { %2961 = vmatmul.mubr.msk.f32.gmra.mrb[42].mxu0 %vm673_vm1, %v1238_v20  ;;  %v1903_v20 = vld [vmem:[%s4867_s10 + $0x70] sm:$0xff] }
  0x7c   : > { %1539 = vmatprep.mubr.f32.mxu0 %v3615_v5 }
  0x7d   : > { %1633 = vperm.xlu1 %3359, %v1603_v24  }
  0x7e   : > { %1628 = vperm.xlu0 %3358, %v1602_v25  }
  0x7f   : > { %2962 = vmatmul.mubr.msk.f32.gmra.mrb[44].mxu0 %vm673_vm1, %v1239_v23 }
  0x80   : > { %1545 = vmatprep.mubr.f32.mxu0 %v3615_v5 }
  0x81   : > { %1643 = vperm.xlu1 %3359, %v1605_v27  }
  0x82   : > { %1638 = vperm.xlu0 %3358, %v1604_v28  }
  0x83   : > { %2963 = vmatmul.mubr.msk.f32.gmra.mrb[46].mxu0 %vm673_vm1, %v1240_v26 }
  0x84   : > { %2113 = vmatprep.mubr.f32.mxu0 %v3615_v5 }
  0x85   : > { %1653 = vperm.xlu1 %3359, %v1607_v30  }
  0x86   : > { %1648 = vperm.xlu0 %3358, %v1606_v31  }
  0x87   : > { %2966 = vmatmul.mubr.msk.f32.vlgmr.msra.gmra.mrb[48].mxu0 %vm673_vm1, %v1889_v29 }
  0x88   : > { %2119 = vmatprep.mubr.f32.mxu0 %v3615_v5 }
  0x89   : > { %1663 = vperm.xlu1 %3359, %v1609_v33  }
  0x8a   : > { %1658 = vperm.xlu0 %3358, %v1608_v34  }
  0x8b   : > { %2967 = vmatmul.mubr.msk.f32.gmra.mrb[50].mxu0 %vm673_vm1, %v1890_v32 }
  0x8c   : > { %2125 = vmatprep.mubr.f32.mxu0 %v3615_v5 }
  0x8d   : > { %1673 = vperm.xlu1 %3359, %v1611_v36  }
  0x8e   : > { %1668 = vperm.xlu0 %3358, %v1610_v37  }
  0x8f   : > { %2968 = vmatmul.mubr.msk.f32.gmra.mrb[52].mxu0 %vm673_vm1, %v1891_v35 }
  0x90   : > { %2131 = vmatprep.mubr.f32.mxu0 %v3615_v5 }
  0x91   : > { %1683 = vperm.xlu1 %3359, %v1613_v39  }
  0x92   : > { %1678 = vperm.xlu0 %3358, %v1612_v40  }
  0x93   : > { %2969 = vmatmul.mubr.msk.f32.gmra.mrb[54].mxu0 %vm673_vm1, %v1892_v38 }
  0x94   : > { %2137 = vmatprep.mubr.f32.mxu0 %v3615_v5 }
  0x95   : > { %1693 = vperm.xlu1 %3359, %v1615_v42  }
  0x96   : > { %1688 = vperm.xlu0 %3358, %v1614_v43  }
  0x97   : > { %2970 = vmatmul.mubr.msk.f32.gmra.mrb[56].mxu0 %vm673_vm1, %v1893_v41  ;;  %v4168_v47 = vpop.permute.xlu1 %603  ;;  %v4170_v48 = vpop.permute.xlu0 %593 }
  0x98   : > { %2143 = vmatprep.mubr.f32.mxu0 %v3615_v5 }
  0x99   : > { %1928 = vperm.xlu1 %3359, %v1906_v45  }
  0x9a   : > { %1923 = vperm.xlu0 %3358, %v1905_v46  }
  0x9b   : > { %2971 = vmatmul.mubr.msk.f32.gmra.mrb[58].mxu0 %vm673_vm1, %v1894_v44  ;;  %v4183_v52 = vpop.permute.xlu1 %608  ;;  %v4185_v53 = vpop.permute.xlu0 %598 }
  0x9c   : > { %2149 = vmatprep.mubr.f32.mxu0 %v3615_v5 }
  0x9d   : > { %1938 = vperm.xlu1 %3359, %v1908_v50  }
  0x9e   : > { %1933 = vperm.xlu0 %3358, %v1907_v51  }
  0x9f   : > { %2972 = vmatmul.mubr.msk.f32.gmra.mrb[60].mxu0 %vm673_vm1, %v1895_v49  ;;  %v4198_v57 = vpop.permute.xlu1 %618  ;;  %v4200_v58 = vpop.permute.xlu0 %613 }
  0xa0   : > { %2155 = vmatprep.mubr.f32.mxu0 %v3615_v5 }
  0xa1   : > { %1948 = vperm.xlu1 %3359, %v1910_v55  }
  0xa2   : > { %1943 = vperm.xlu0 %3358, %v1909_v56  }
  0xa3   : > { %2973 = vmatmul.mubr.msk.f32.gmra.mrb[62].mxu0 %vm673_vm1, %v1896_v54  ;;  %v4213_v62 = vpop.permute.xlu0 %623  ;;  %v4219_v0 = vpop.permute.xlu1 %628 }
  0xa4   : > { %2161 = vmatprep.mubr.f32.mxu0 %v3615_v5 }
  0xa5   : > { %1958 = vperm.xlu1 %3359, %v1912_v60  }
  0xa6   : > { %1953 = vperm.xlu0 %3358, %v1911_v61  }
  0xa7   : > { %2974 = vmatmul.mubr.msk.f32.gmra.mrb[64].mxu0 %vm673_vm1, %v1897_v59 }
  0xa8   : > { %2167 = vmatprep.mubr.f32.mxu0 %v3615_v5  ;;  %v4240_v8 = vpop.permute.xlu1 %638 }
  0xa9   : > { %v4228_v3 = vpop.permute.xlu0 %633  ;;  %1968 = vperm.xlu1 %3359, %v1914_v1  }
  0xaa   : > { %1963 = vperm.xlu0 %3358, %v1913_v2  }
  0xab   : > { %2975 = vmatmul.mubr.msk.f32.gmra.mrb[66].mxu0 %vm673_vm1, %v1898_v63 }
  0xac   : > { %2173 = vmatprep.mubr.f32.mxu0 %v3615_v5  ;;  %v4260_v14 = vpop.permute.xlu1 %648 }
  0xad   : > { %v4247_v10 = vpop.permute.xlu0 %643  ;;  %1978 = vperm.xlu1 %3359, %v1916_v6  }
  0xae   : > { %1973 = vperm.xlu0 %3358, %v1915_v7  }
  0xaf   : > { %2976 = vmatmul.mubr.msk.f32.gmra.mrb[68].mxu0 %vm673_vm1, %v1899_v4 }
  0xb0   : > { %2179 = vmatprep.mubr.f32.mxu0 %v3615_v5  ;;  %v4275_v19 = vpop.permute.xlu1 %658 }
  0xb1   : > { %1988 = vperm.xlu1 %3359, %v1918_v11   ;;  %v4268_v17 = vpop.permute.xlu0 %653 }
  0xb2   : > { %1983 = vperm.xlu0 %3358, %v1917_v12  }
  0xb3   : > { %2977 = vmatmul.mubr.msk.f32.gmra.mrb[70].mxu0 %vm673_vm1, %v1900_v9 }
  0xb4   : > { %2185 = vmatprep.mubr.f32.mxu0 %v3615_v5  ;;  %v4289_v23 = vpop.permute.xlu1 %668 }
  0xb5   : > { %1998 = vperm.xlu1 %3359, %v1920_v15   ;;  %v4282_v21 = vpop.permute.xlu0 %663 }
  0xb6   : > { %1993 = vperm.xlu0 %3358, %v1919_v16  }
  0xb7   : > { %2978 = vmatmul.mubr.msk.f32.gmra.mrb[72].mxu0 %vm673_vm1, %v1901_v13 }
  0xb8   : > { %2191 = vmatprep.mubr.f32.mxu0 %v3615_v5  ;;  %v4294_v25 = vpop.permute.xlu1 %1264 }
  0xb9   : > { %v4291_v24 = vpop.permute.xlu0 %1259 }
  0xbb   : > { %2979 = vmatmul.mubr.msk.f32.gmra.mrb[74].mxu0 %vm673_vm1, %v1902_v18 }
  0xbc   : > { %2197 = vmatprep.mubr.f32.mxu0 %v3615_v5  ;;  %v4298_v27 = vpop.permute.xlu1 %1274 }
  0xbd   : > { %v4296_v26 = vpop.permute.xlu0 %1269 }
  0xbf   : > { %2980 = vmatmul.mubr.msk.f32.gmra.mrb[76].mxu0 %vm673_vm1, %v1903_v20 }
  0xc0   : > { %2203 = vmatprep.mubr.f32.mxu0 %v3615_v5  ;;  %v4302_v29 = vpop.permute.xlu1 %1284 }
  0xc1   : > { %v4300_v28 = vpop.permute.xlu0 %1279 }
  0xc3   : > { %2981 = vmatmul.mubr.msk.f32.gmra.mrb[78].mxu0 %vm673_vm1, %v1904_v22 }
  0xc4   : > { %v4306_v31 = vpop.permute.xlu1 %1294 }
  0xc5   : > { %v4304_v30 = vpop.permute.xlu0 %1289 }
  0xc8   : > { %v4310_v33 = vpop.permute.xlu1 %1304 }
  0xc9   : > { %v4308_v32 = vpop.permute.xlu0 %1299 }
  0xcc   : > { %v4314_v35 = vpop.permute.xlu1 %1314 }
  0xcd   : > { %v4312_v34 = vpop.permute.xlu0 %1309 }
  0xd0   : > { %v4318_v37 = vpop.permute.xlu1 %1324 }
  0xd1   : > { %v4316_v36 = vpop.permute.xlu0 %1319 }
  0xd4   : > { %v4322_v39 = vpop.permute.xlu1 %1334 }
  0xd5   : > { %v4320_v38 = vpop.permute.xlu0 %1329 }
  0xd8   : > { %v4326_v41 = vpop.permute.xlu1 %959 }
  0xd9   : > { %v4324_v40 = vpop.permute.xlu0 %954 }
  0xdc   : > { %v4332_v51 = vpop.permute.xlu1 %969 }
  0xdd   : > { %v4328_v42 = vpop.permute.xlu0 %964 }
  0xe1   : > { %v4340_v7 = vpop.permute.xlu0 %974 }
  0xfa   : > { %v793_v43 = vpop.f32.mrb[0].mxu0  ;;  %v841_v44 = vpop.f32.mrb[0].mxu1 }
  0xfb   : > { %v795_v45 = vpop.f32.mrb[1].mxu0  ;;  %v842_v46 = vadd.f32 %v841_v44, %v4228_v3  ;;  %v843_v49 = vpop.f32.mrb[1].mxu1  ;;  %v794_v54 = vadd.f32 %v793_v43, %v4170_v48 }
  0xfc   : > { %v844_v50 = vadd.f32 %v843_v49, %v4228_v3  ;;  %v796_v55 = vadd.f32 %v795_v45, %v4170_v48  ;;  %v4348_v49 = vpop.permute.xlu1 %979 }
  0xfd   : > { %v904_v63 = vmax.f32 %v842_v46, 0.0  ;;  %v888_v9 = vmax.f32 %v794_v54, 0.0 }
  0xfe   : > { %v799_v56 = vpop.f32.mrb[2].mxu0  ;;  %v847_v59 = vpop.f32.mrb[2].mxu1  ;;  %v905_v6 = vmax.f32 %v844_v50, 0.0  ;;  %v889_v48 = vmax.f32 %v796_v55, 0.0 }
  0xff   : > { %v800_v60 = vadd.f32 %v799_v56, %v4185_v53  ;;  %v801_v61 = vpop.f32.mrb[3].mxu0  ;;  %v848_v1 = vadd.f32 %v847_v59, %v4240_v8  ;;  %v849_v2 = vpop.f32.mrb[3].mxu1 }
 0x100   : > { %v802_v4 = vadd.f32 %v801_v61, %v4185_v53  ;;  %v850_v3 = vadd.f32 %v849_v2, %v4240_v8 }
 0x101   : > { %v890_v11 = vmax.f32 %v800_v60, 0.0  ;;  %v906_v12 = vmax.f32 %v848_v1, 0.0 }
 0x102   : > { %v891_v13 = vmax.f32 %v802_v4, 0.0  ;;  %v805_v15 = vpop.f32.mrb[4].mxu0  ;;  %v907_v16 = vmax.f32 %v850_v3, 0.0  ;;  %v853_v18 = vpop.f32.mrb[4].mxu1 }
 0x103   : > { %v3223_v20 = vpack.c.bf16 %v890_v11, %v888_v9  ;;  %v4342_v22 = vpack.c.bf16 %v906_v12, %v904_v63  ;;  %v807_v43 = vpop.f32.mrb[5].mxu0  ;;  %v854_v44 = vadd.f32 %v853_v18, %v4247_v10  ;;  %v855_v53 = vpop.f32.mrb[5].mxu1  ;;  %v806_v50 = vadd.f32 %v805_v15, %v4168_v47 }
 0x104   : > { %v3221_v45 = vpack.c.bf16 %v891_v13, %v889_v48  ;;  %v4345_v46 = vpack.c.bf16 %v907_v16, %v905_v6  ;;  %v856_v8 = vadd.f32 %v855_v53, %v4247_v10  ;;  %v808_v54 = vadd.f32 %v807_v43, %v4168_v47  ;;  %v4356_v6 = vpop.permute.xlu0 %984 }
 0x105   : > { %v908_v59 = vmax.f32 %v854_v44, 0.0  ;;  %v892_v3 = vmax.f32 %v806_v50, 0.0 }
 0x106   : > { %v811_v55 = vpop.f32.mrb[6].mxu0  ;;  %v859_v56 = vpop.f32.mrb[6].mxu1  ;;  %3222 = vmatprep.subr.bf16.mxu1 %v3221_v45  ;;  %v909_v2 = vmax.f32 %v856_v8, 0.0  ;;  %v893_v11 = vmax.f32 %v808_v54, 0.0 }
 0x107   : > { %v812_v60 = vadd.f32 %v811_v55, %v4183_v52  ;;  %v860_v61 = vadd.f32 %v859_v56, %v4260_v14  ;;  %v813_v63 = vpop.f32.mrb[7].mxu0  ;;  %v861_v1 = vpop.f32.mrb[7].mxu1  ;;  %3224 = vmatpush1.bf16.msra.mxu1 %v3223_v20 }
 0x108   : > { %v814_v10 = vadd.f32 %v813_v63, %v4183_v52  ;;  %v862_v4 = vadd.f32 %v861_v1, %v4260_v14  ;;  %v4362_v52 = vpop.permute.xlu1 %989 }
 0x109   : > { %v894_v47 = vmax.f32 %v812_v60, 0.0  ;;  %v910_v9 = vmax.f32 %v860_v61, 0.0 }
 0x10a   : > { %v895_v12 = vmax.f32 %v814_v10, 0.0  ;;  %v911_v48 = vmax.f32 %v862_v4, 0.0  ;;  %v817_v13 = vpop.f32.mrb[8].mxu0  ;;  %v865_v15 = vpop.f32.mrb[8].mxu1 }
 0x10b   : > { %v3227_v16 = vpack.c.bf16 %v894_v47, %v892_v3  ;;  %v4358_v18 = vpack.c.bf16 %v910_v9, %v908_v59  ;;  %v819_v43 = vpop.f32.mrb[9].mxu0  ;;  %v867_v20 = vpop.f32.mrb[9].mxu1  ;;  %v818_v14 = vadd.f32 %v817_v13, %v4200_v58  ;;  %v866_v45 = vadd.f32 %v865_v15, %v4268_v17 }
 0x10c   : > { %v3225_v44 = vpack.c.bf16 %v895_v12, %v893_v11  ;;  %v4360_v53 = vpack.c.bf16 %v911_v48, %v909_v2  ;;  %v820_v8 = vadd.f32 %v819_v43, %v4200_v58  ;;  %v868_v50 = vadd.f32 %v867_v20, %v4268_v17  ;;  %v4372_v2 = vpop.permute.xlu0 %994 }
 0x10d   : > { %v896_v10 = vmax.f32 %v818_v14, 0.0  ;;  %v912_v58 = vmax.f32 %v866_v45, 0.0 }
 0x10e   : > { %v823_v54 = vpop.f32.mrb[10].mxu0  ;;  %v871_v55 = vpop.f32.mrb[10].mxu1  ;;  %3226 = vmatprep.subr.bf16.mxu1 %v3225_v44  ;;  %v897_v3 = vmax.f32 %v820_v8, 0.0  ;;  %v913_v47 = vmax.f32 %v868_v50, 0.0 }
 0x10f   : > { %v824_v56 = vadd.f32 %v823_v54, %v4198_v57  ;;  %v872_v59 = vadd.f32 %v871_v55, %v4275_v19  ;;  %v825_v60 = vpop.f32.mrb[11].mxu0  ;;  %v873_v61 = vpop.f32.mrb[11].mxu1  ;;  %3228 = vmatpush1.bf16.msra.mxu1 %v3227_v16 }
 0x110   : > { %v826_v63 = vadd.f32 %v825_v60, %v4198_v57  ;;  %v874_v1 = vadd.f32 %v873_v61, %v4275_v19  ;;  %v4376_v19 = vpop.permute.xlu1 %999  ;;  %v4384_v61 = vpop.permute.xlu0 %1004 }
 0x111   : > { %v898_v4 = vmax.f32 %v824_v56, 0.0  ;;  %v914_v17 = vmax.f32 %v872_v59, 0.0 }
 0x112   : > { %v899_v9 = vmax.f32 %v826_v63, 0.0  ;;  %v915_v11 = vmax.f32 %v874_v1, 0.0  ;;  %v829_v12 = vpop.f32.mrb[12].mxu0  ;;  %v877_v48 = vpop.f32.mrb[12].mxu1 }
 0x113   : > { %v3231_v13 = vpack.c.bf16 %v898_v4, %v896_v10  ;;  %v4374_v15 = vpack.c.bf16 %v914_v17, %v912_v58  ;;  %v831_v16 = vpop.f32.mrb[13].mxu0  ;;  %v879_v43 = vpop.f32.mrb[13].mxu1  ;;  %v830_v44 = vadd.f32 %v829_v12, %v4213_v62  ;;  %v878_v14 = vadd.f32 %v877_v48, %v4282_v21 }
 0x114   : > { %v3229_v57 = vpack.c.bf16 %v899_v9, %v897_v3  ;;  %v3245_v20 = vpack.c.bf16 %v915_v11, %v913_v47  ;;  %v832_v45 = vadd.f32 %v831_v16, %v4213_v62  ;;  %v880_v8 = vadd.f32 %v879_v43, %v4282_v21  ;;  %v4388_v16 = vpop.permute.xlu1 %1009 }
 0x115   : > { %v900_v10 = vmax.f32 %v830_v44, 0.0  ;;  %v916_v62 = vmax.f32 %v878_v14, 0.0 }
 0x116   : > { %v835_v50 = vpop.f32.mrb[14].mxu0  ;;  %v883_v54 = vpop.f32.mrb[14].mxu1  ;;  %3230 = vmatprep.subr.bf16.mxu1 %v3229_v57  ;;  %v901_v4 = vmax.f32 %v832_v45, 0.0  ;;  %v917_v17 = vmax.f32 %v880_v8, 0.0 }
 0x117   : > { %v836_v55 = vadd.f32 %v835_v50, %v4219_v0  ;;  %v884_v56 = vadd.f32 %v883_v54, %v4289_v23  ;;  %v837_v59 = vpop.f32.mrb[15].mxu0  ;;  %v885_v60 = vpop.f32.mrb[15].mxu1  ;;  %3232 = vmatpush1.bf16.msra.mxu1 %v3231_v13 }
 0x118   : > { %v838_v63 = vadd.f32 %v837_v59, %v4219_v0  ;;  %v886_v1 = vadd.f32 %v885_v60, %v4289_v23  ;;  %v4391_v57 = vpop.permute.xlu0 %1014 }
 0x119   : > { %v902_v58 = vmax.f32 %v836_v55, 0.0  ;;  %v918_v21 = vmax.f32 %v884_v56, 0.0  ;;  %v4397_v55 = vpop.permute.xlu1 %1019 }
 0x11a   : > { %v903_v3 = vmax.f32 %v838_v63, 0.0  ;;  %v919_v47 = vmax.f32 %v886_v1, 0.0  ;;  %v1457_v9 = vpop.f32.mrb[16].mxu0 }
 0x11b   : > { %v3235_v11 = vpack.c.bf16 %v902_v58, %v900_v10  ;;  %v3251_v12 = vpack.c.bf16 %v918_v21, %v916_v62  ;;  %v1459_v48 = vpop.f32.mrb[17].mxu0  ;;  %v1458_v0 = vadd.f32 %v1457_v9, %v4291_v24 }
 0x11c   : > { %v3233_v13 = vpack.c.bf16 %v903_v3, %v901_v4  ;;  %v3249_v43 = vpack.c.bf16 %v919_v47, %v917_v17  ;;  %v1460_v23 = vadd.f32 %v1459_v48, %v4291_v24  ;;  %v4400_v1 = vpop.permute.xlu0 %1024 }
 0x11d   : > { %v1552_v50 = vmax.f32 %v1458_v0, 0.0  ;;  %v4407_v4 = vpop.permute.xlu1 %1029 }
 0x11e   : > { %3234 = vmatprep.subr.bf16.mxu1 %v3233_v13  ;;  %v1463_v44 = vpop.f32.mrb[18].mxu0  ;;  %v1553_v56 = vmax.f32 %v1460_v23, 0.0 }
 0x11f   : > { %v1464_v14 = vadd.f32 %v1463_v44, %v4294_v25  ;;  %3236 = vmatpush1.bf16.msra.mxu1 %v3235_v11  ;;  %v1465_v45 = vpop.f32.mrb[19].mxu0 }
 0x120   : > { %v1466_v8 = vadd.f32 %v1465_v45, %v4294_v25  ;;  %3238 = vmatprep.subr.bf16.mxu1 %v4345_v46  ;;  %v4410_v47 = vpop.permute.xlu0 %1618 }
 0x121   : > { %v1554_v54 = vmax.f32 %v1464_v14, 0.0  ;;  %v4414_v0 = vpop.permute.xlu1 %1623  ;;  %v920_v14 = vld [vmem:[%s4861_s4] sm:$0xff] }
 0x122   : > { %v1555_v59 = vmax.f32 %v1466_v8, 0.0  ;;  %v1469_v60 = vpop.f32.mrb[20].mxu0 }
 0x123   : > { %v3255_v63 = vpack.c.bf16 %v1554_v54, %v1552_v50  ;;  %3240 = vmatpush1.bf16.msra.mxu1 %v4342_v22  ;;  %v1471_v24 = vpop.f32.mrb[21].mxu0  ;;  %v1470_v25 = vadd.f32 %v1469_v60, %v4296_v26 }
 0x124   : > { %v3253_v10 = vpack.c.bf16 %v1555_v59, %v1553_v56  ;;  %3242 = vmatprep.subr.bf16.mxu1 %v4360_v53  ;;  %v1472_v46 = vadd.f32 %v1471_v24, %v4296_v26  ;;  %v4421_v45 = vpop.permute.xlu0 %1628 }
 0x125   : > { %v1556_v17 = vmax.f32 %v1470_v25, 0.0  ;;  %v4428_v60 = vpop.permute.xlu1 %1633 }
 0x126   : > { %v1475_v62 = vpop.f32.mrb[22].mxu0  ;;  %v1557_v53 = vmax.f32 %v1472_v46, 0.0 }
 0x127   : > { %v1476_v58 = vadd.f32 %v1475_v62, %v4298_v27  ;;  %3244 = vmatpush1.bf16.msra.mxu1 %v4358_v18  ;;  %v1477_v21 = vpop.f32.mrb[23].mxu0 }
 0x128   : > { %v1478_v22 = vadd.f32 %v1477_v21, %v4298_v27  ;;  %3246 = vmatprep.subr.bf16.mxu1 %v3245_v20 }
 0x129   : > { %v1558_v3 = vmax.f32 %v1476_v58, 0.0  ;;  %v922_v58 = vld [vmem:[%s4861_s4 + $0x10] sm:$0xff] }
 0x12a   : > { %v1559_v9 = vmax.f32 %v1478_v22, 0.0  ;;  %v1481_v11 = vpop.f32.mrb[24].mxu0 }
 0x12b   : > { %v3259_v48 = vpack.c.bf16 %v1558_v3, %v1556_v17  ;;  %3248 = vmatpush1.bf16.msra.mxu1 %v4374_v15  ;;  %v1483_v26 = vpop.f32.mrb[25].mxu0  ;;  %v1482_v18 = vadd.f32 %v1481_v11, %v4300_v28  ;;  %v4440_v3 = vpop.permute.xlu1 %1643 }
 0x12c   : > { %v3257_v13 = vpack.c.bf16 %v1559_v9, %v1557_v53  ;;  %3250 = vmatprep.subr.bf16.mxu1 %v3249_v43  ;;  %v1484_v27 = vadd.f32 %v1483_v26, %v4300_v28 }
 0x12d   : > { %v1560_v43 = vmax.f32 %v1482_v18, 0.0 }
 0x12e   : > { %v1487_v20 = vpop.f32.mrb[26].mxu0  ;;  %v1561_v50 = vmax.f32 %v1484_v27, 0.0 }
 0x12f   : > { %v1488_v23 = vadd.f32 %v1487_v20, %v4302_v29  ;;  %3252 = vmatpush1.bf16.msra.mxu1 %v3251_v12  ;;  %v1489_v44 = vpop.f32.mrb[27].mxu0  ;;  %v921_v12 = vld [vmem:[%s4861_s4 + $0x8] sm:$0xff] }
 0x130   : > { %v1490_v15 = vadd.f32 %v1489_v44, %v4302_v29  ;;  %3254 = vmatprep.subr.bf16.mxu1 %v3253_v10  ;;  %v4431_v10 = vpop.permute.xlu0 %1638 }
 0x131   : > { %v1562_v8 = vmax.f32 %v1488_v23, 0.0 }
 0x132   : > { %v1563_v54 = vmax.f32 %v1490_v15, 0.0  ;;  %1097 = vmatmul.mubr.f32.vlgmr.msra.gmra.mrb[16].mxu1 %v920_v14  ;;  %v1493_v28 = vpop.f32.mrb[28].mxu0  ;;  %v924_v14 = vld [vmem:[%s4861_s4 + $0x20] sm:$0xff]  ;;  %v4455_v15 = vpop.permute.xlu1 %1653 }
 0x133   : > { %v3263_v56 = vpack.c.bf16 %v1562_v8, %v1560_v43  ;;  %v1495_v59 = vpop.f32.mrb[29].mxu0  ;;  %3256 = vmatpush1.bf16.msra.mxu1 %v3255_v63  ;;  %1102 = vmatprep.mubr.f32.mxu1 %v3615_v5  ;;  %v1494_v29 = vadd.f32 %v1493_v28, %v4304_v30 }
 0x134   : > { %v3261_v24 = vpack.c.bf16 %v1563_v54, %v1561_v50  ;;  %3258 = vmatprep.subr.bf16.mxu1 %v3257_v13  ;;  %v1496_v25 = vadd.f32 %v1495_v59, %v4304_v30  ;;  %v4446_v13 = vpop.permute.xlu0 %1648 }
 0x135   : > { %v1564_v22 = vmax.f32 %v1494_v29, 0.0 }
 0x136   : > { %1103 = vmatmul.mubr.f32.gmra.mrb[18].mxu1 %v921_v12  ;;  %v1499_v46 = vpop.f32.mrb[30].mxu0  ;;  %v1565_v30 = vmax.f32 %v1496_v25, 0.0 }
 0x137   : > { %v1500_v63 = vadd.f32 %v1499_v46, %v4306_v31  ;;  %v1501_v62 = vpop.f32.mrb[31].mxu0  ;;  %3260 = vmatpush1.bf16.msra.mxu1 %v3259_v48  ;;  %1108 = vmatprep.mubr.f32.mxu1 %v3615_v5  ;;  %v923_v48 = vld [vmem:[%s4861_s4 + $0x18] sm:$0xff] }
 0x138   : > { %v1502_v21 = vadd.f32 %v1501_v62, %v4306_v31  ;;  %3262 = vmatprep.subr.bf16.mxu1 %v3261_v24  ;;  %v925_v24 = vld [vmem:[%s4861_s4 + $0x28] sm:$0xff] }
 0x139   : > { %v1566_v17 = vmax.f32 %v1500_v63, 0.0 }
 0x13a   : > { %v1567_v53 = vmax.f32 %v1502_v21, 0.0  ;;  %1109 = vmatmul.mubr.f32.gmra.mrb[20].mxu1 %v922_v58  ;;  %v1505_v9 = vpop.f32.mrb[32].mxu0  ;;  %v926_v21 = vld [vmem:[%s4861_s4 + $0x30] sm:$0xff] }
 0x13b   : > { %v3267_v11 = vpack.c.bf16 %v1566_v17, %v1564_v22  ;;  %v1507_v26 = vpop.f32.mrb[33].mxu0  ;;  %3264 = vmatpush1.bf16.msra.mxu1 %v3263_v56  ;;  %1114 = vmatprep.mubr.f32.mxu1 %v3615_v5  ;;  %v1506_v18 = vadd.f32 %v1505_v9, %v4308_v32 }
 0x13c   : > { %v3265_v31 = vpack.c.bf16 %v1567_v53, %v1565_v30  ;;  %v1508_v27 = vadd.f32 %v1507_v26, %v4308_v32  ;;  %v4458_v32 = vpop.permute.xlu0 %1658 }
 0x13d   : > { %v1568_v8 = vmax.f32 %v1506_v18, 0.0 }
 0x13e   : > { %1115 = vmatmul.mubr.f32.gmra.mrb[22].mxu1 %v923_v48  ;;  %v1511_v20 = vpop.f32.mrb[34].mxu0  ;;  %3266 = vmatprep.subr.bf16.mxu1 %v3265_v31  ;;  %v1569_v54 = vmax.f32 %v1508_v27, 0.0  ;;  %v927_v31 = vld [vmem:[%s4861_s4 + $0x38] sm:$0xff] }
 0x13f   : > { %v1512_v23 = vadd.f32 %v1511_v20, %v4310_v33  ;;  %v1513_v44 = vpop.f32.mrb[35].mxu0  ;;  %3268 = vmatpush1.bf16.msra.mxu1 %v3267_v11  ;;  %1120 = vmatprep.mubr.f32.mxu1 %v3615_v5 }
 0x140   : > { %v1514_v43 = vadd.f32 %v1513_v44, %v4310_v33  ;;  %v4465_v33 = vpop.permute.xlu1 %1663  ;;  %v4473_v22 = vpop.permute.xlu0 %1668 }
 0x141   : > { %v1570_v50 = vmax.f32 %v1512_v23, 0.0 }
 0x142   : > { %v1571_v28 = vmax.f32 %v1514_v43, 0.0  ;;  %1121 = vmatmul.mubr.f32.gmra.mrb[24].mxu1 %v924_v14  ;;  %v1517_v56 = vpop.f32.mrb[36].mxu0 }
 0x143   : > { %v3271_v59 = vpack.c.bf16 %v1570_v50, %v1568_v8  ;;  %v1519_v12 = vpop.f32.mrb[37].mxu0  ;;  %1126 = vmatprep.mubr.f32.mxu1 %v3615_v5  ;;  %v1518_v25 = vadd.f32 %v1517_v56, %v4312_v34  ;;  %v928_v8 = vld [vmem:[%s4861_s4 + $0x40] sm:$0xff] }
 0x144   : > { %v3269_v29 = vpack.c.bf16 %v1571_v28, %v1569_v54  ;;  %v1520_v46 = vadd.f32 %v1519_v12, %v4312_v34  ;;  %v4480_v18 = vpop.permute.xlu1 %1673 }
 0x145   : > { %v1572_v30 = vmax.f32 %v1518_v25, 0.0 }
 0x146   : > { %1127 = vmatmul.mubr.f32.gmra.mrb[26].mxu1 %v925_v24  ;;  %v1523_v63 = vpop.f32.mrb[38].mxu0  ;;  %3270 = vmatprep.subr.bf16.mxu1 %v3269_v29  ;;  %v1573_v34 = vmax.f32 %v1520_v46, 0.0  ;;  %v929_v46 = vld [vmem:[%s4861_s4 + $0x48] sm:$0xff] }
 0x147   : > { %v1524_v62 = vadd.f32 %v1523_v63, %v4314_v35  ;;  %v1525_v58 = vpop.f32.mrb[39].mxu0  ;;  %3272 = vmatpush1.bf16.msra.mxu1 %v3271_v59  ;;  %1132 = vmatprep.mubr.f32.mxu1 %v3615_v5 }
 0x148   : > { %v1526_v17 = vadd.f32 %v1525_v58, %v4314_v35  ;;  %v4483_v35 = vpop.permute.xlu0 %1678  ;;  %v4492_v56 = vpop.permute.xlu1 %1683 }
 0x149   : > { %v1574_v53 = vmax.f32 %v1524_v62, 0.0 }
 0x14a   : > { %v1575_v9 = vmax.f32 %v1526_v17, 0.0  ;;  %1133 = vmatmul.mubr.f32.gmra.mrb[28].mxu1 %v926_v21  ;;  %v1529_v11 = vpop.f32.mrb[40].mxu0 }
 0x14b   : > { %v3275_v26 = vpack.c.bf16 %v1574_v53, %v1572_v30  ;;  %v1531_v48 = vpop.f32.mrb[41].mxu0  ;;  %1138 = vmatprep.mubr.f32.mxu1 %v3615_v5  ;;  %v1530_v20 = vadd.f32 %v1529_v11, %v4316_v36  ;;  %v930_v30 = vld [vmem:[%s4861_s4 + $0x50] sm:$0xff] }
 0x14c   : > { %v3273_v27 = vpack.c.bf16 %v1575_v9, %v1573_v34  ;;  %v1532_v23 = vadd.f32 %v1531_v48, %v4316_v36  ;;  %v4507_v53 = vpop.permute.xlu1 %1693 }
 0x14d   : > { %v1576_v54 = vmax.f32 %v1530_v20, 0.0 }
 0x14e   : > { %1139 = vmatmul.mubr.f32.gmra.mrb[30].mxu1 %v927_v31  ;;  %v1535_v44 = vpop.f32.mrb[42].mxu0  ;;  %3274 = vmatprep.subr.bf16.mxu1 %v3273_v27  ;;  %v1577_v36 = vmax.f32 %v1532_v23, 0.0 }
 0x14f   : > { %v1536_v14 = vadd.f32 %v1535_v44, %v4318_v37  ;;  %v1537_v43 = vpop.f32.mrb[43].mxu0  ;;  %3276 = vmatpush1.bf16.msra.mxu1 %v3275_v26  ;;  %1144 = vmatprep.mubr.f32.mxu1 %v3615_v5  ;;  %v931_v44 = vld [vmem:[%s4861_s4 + $0x58] sm:$0xff] }
 0x150   : > { %v1538_v50 = vadd.f32 %v1537_v43, %v4318_v37  ;;  %v4499_v37 = vpop.permute.xlu0 %1688 }
 0x151   : > { %v1578_v28 = vmax.f32 %v1536_v14, 0.0 }
 0x152   : > { %v1579_v59 = vmax.f32 %v1538_v50, 0.0  ;;  %1145 = vmatmul.mubr.f32.gmra.mrb[32].mxu1 %v928_v8  ;;  %v1541_v12 = vpop.f32.mrb[44].mxu0  ;;  %v1929_v8 = vpop.permute.xlu1 %1928 }
 0x153   : > { %v3279_v24 = vpack.c.bf16 %v1578_v28, %v1576_v54  ;;  %v1542_v29 = vadd.f32 %v1541_v12, %v4320_v38  ;;  %v1543_v25 = vpop.f32.mrb[45].mxu0  ;;  %1150 = vmatprep.mubr.f32.mxu1 %v3615_v5 }
 0x154   : > { %v3277_v63 = vpack.c.bf16 %v1579_v59, %v1577_v36  ;;  %v1544_v62 = vadd.f32 %v1543_v25, %v4320_v38  ;;  %v1924_v11 = vpop.permute.xlu0 %1923  ;;  %v932_v59 = vld [vmem:[%s4861_s4 + $0x60] sm:$0xff] }
 0x155   : > { %v1580_v9 = vmax.f32 %v1542_v29, 0.0 }
 0x156   : > { %1151 = vmatmul.mubr.f32.gmra.mrb[34].mxu1 %v929_v46  ;;  %v1547_v58 = vpop.f32.mrb[46].mxu0  ;;  %3278 = vmatprep.subr.bf16.mxu1 %v3277_v63  ;;  %v1581_v26 = vmax.f32 %v1544_v62, 0.0 }
 0x157   : > { %v1548_v21 = vadd.f32 %v1547_v58, %v4322_v39  ;;  %v1549_v17 = vpop.f32.mrb[47].mxu0  ;;  %3280 = vmatpush1.bf16.msra.mxu1 %v3279_v24  ;;  %1156 = vmatprep.mubr.f32.mxu1 %v3615_v5 }
 0x158   : > { %v1550_v34 = vadd.f32 %v1549_v17, %v4322_v39  ;;  %v1934_v25 = vpop.permute.xlu0 %1933 }
 0x159   : > { %v1582_v38 = vmax.f32 %v1548_v21, 0.0  ;;  %v933_v21 = vld [vmem:[%s4861_s4 + $0x68] sm:$0xff] }
 0x15a   : > { %v1583_v48 = vmax.f32 %v1550_v34, 0.0  ;;  %1157 = vmatmul.mubr.f32.gmra.mrb[36].mxu1 %v930_v30  ;;  %v2115_v31 = vpop.f32.mrb[48].mxu0 }
 0x15b   : > { %v3283_v27 = vpack.c.bf16 %v1582_v38, %v1580_v9  ;;  %v2116_v20 = vadd.f32 %v2115_v31, %v1924_v11  ;;  %v2117_v23 = vpop.f32.mrb[49].mxu0  ;;  %1162 = vmatprep.mubr.f32.mxu1 %v3615_v5  ;;  %v1939_v9 = vpop.permute.xlu1 %1938  ;;  %v934_v31 = vld [vmem:[%s4861_s4 + $0x70] sm:$0xff] }
 0x15c   : > { %v3281_v14 = vpack.c.bf16 %v1583_v48, %v1581_v26  ;;  %v2118_v39 = vadd.f32 %v2117_v23, %v1924_v11 }
 0x15d   : > { %v2210_v43 = vmax.f32 %v2116_v20, 0.0 }
 0x15e   : > { %v2211_v50 = vmax.f32 %v2118_v39, 0.0  ;;  %1163 = vmatmul.mubr.f32.gmra.mrb[38].mxu1 %v931_v44  ;;  %3282 = vmatprep.subr.bf16.mxu1 %v3281_v14  ;;  %v2121_v54 = vpop.f32.mrb[50].mxu0  ;;  %v1944_v44 = vpop.permute.xlu0 %1943 }
 0x15f   : > { %v2122_v28 = vadd.f32 %v2121_v54, %v1929_v8  ;;  %3284 = vmatpush1.bf16.msra.mxu1 %v3283_v27  ;;  %v2123_v36 = vpop.f32.mrb[51].mxu0  ;;  %1168 = vmatprep.mubr.f32.mxu1 %v3615_v5 }
 0x160   : > { %v3107_v12 = vpack.c.bf16 %v2211_v50, %v2210_v43  ;;  %v2124_v24 = vadd.f32 %v2123_v36, %v1929_v8  ;;  %v935_v50 = vld [vmem:[%s4861_s4 + $0x78] sm:$0xff] }
 0x161   : > { %v2212_v29 = vmax.f32 %v2122_v28, 0.0 }
 0x162   : > { %2674 = vst [vmem:[%s4524_s17] sm:$0xff] %v3107_v12  ;;  %v2213_v46 = vmax.f32 %v2124_v24, 0.0  ;;  %1169 = vmatmul.mubr.f32.gmra.mrb[40].mxu1 %v932_v59  ;;  %v2127_v63 = vpop.f32.mrb[52].mxu0  ;;  %v1949_v59 = vpop.permute.xlu1 %1948 }
 0x163   : > { %v2128_v62 = vadd.f32 %v2127_v63, %v1934_v25  ;;  %v2129_v58 = vpop.f32.mrb[53].mxu0  ;;  %1174 = vmatprep.mubr.f32.mxu1 %v3615_v5 }
 0x164   : > { %v3108_v17 = vpack.c.bf16 %v2213_v46, %v2212_v29  ;;  %v2130_v30 = vadd.f32 %v2129_v58, %v1934_v25  ;;  %v1584_v46 = vld [vmem:[%s4865_s8] sm:$0xff] }
 0x165   : > { %v2214_v34 = vmax.f32 %v2128_v62, 0.0 }
 0x166   : > { %2675 = vst [vmem:[%s4524_s17 + $0x8] sm:$0xff] %v3108_v17  ;;  %v2215_v38 = vmax.f32 %v2130_v30, 0.0  ;;  %1175 = vmatmul.mubr.f32.gmra.mrb[42].mxu1 %v933_v21  ;;  %v2133_v11 = vpop.f32.mrb[54].mxu0  ;;  %v1954_v21 = vpop.permute.xlu0 %1953 }
 0x167   : > { %v2134_v26 = vadd.f32 %v2133_v11, %v1939_v9  ;;  %v2135_v48 = vpop.f32.mrb[55].mxu0  ;;  %1180 = vmatprep.mubr.f32.mxu1 %v3615_v5 }
 0x168   : > { %v3109_v27 = vpack.c.bf16 %v2215_v38, %v2214_v34  ;;  %v2136_v20 = vadd.f32 %v2135_v48, %v1939_v9  ;;  %v1585_v38 = vld [vmem:[%s4865_s8 + $0x8] sm:$0xff] }
 0x169   : > { %v2216_v23 = vmax.f32 %v2134_v26, 0.0 }
 0x16a   : > { %2676 = vst [vmem:[%s4524_s17 + $0x10] sm:$0xff] %v3109_v27  ;;  %v2217_v14 = vmax.f32 %v2136_v20, 0.0  ;;  %1181 = vmatmul.mubr.f32.gmra.mrb[44].mxu1 %v934_v31  ;;  %v2139_v39 = vpop.f32.mrb[56].mxu0  ;;  %v1959_v31 = vpop.permute.xlu1 %1958 }
 0x16b   : > { %v2140_v43 = vadd.f32 %v2139_v39, %v1944_v44  ;;  %v2141_v8 = vpop.f32.mrb[57].mxu0  ;;  %1186 = vmatprep.mubr.f32.mxu1 %v3615_v5 }
 0x16c   : > { %v3110_v54 = vpack.c.bf16 %v2217_v14, %v2216_v23  ;;  %v2142_v28 = vadd.f32 %v2141_v8, %v1944_v44  ;;  %v1586_v14 = vld [vmem:[%s4865_s8 + $0x10] sm:$0xff] }
 0x16d   : > { %v2218_v36 = vmax.f32 %v2140_v43, 0.0 }
 0x16e   : > { %2677 = vst [vmem:[%s4524_s17 + $0x18] sm:$0xff] %v3110_v54  ;;  %v2219_v12 = vmax.f32 %v2142_v28, 0.0  ;;  %1187 = vmatmul.mubr.f32.gmra.mrb[46].mxu1 %v935_v50  ;;  %v2145_v24 = vpop.f32.mrb[58].mxu0  ;;  %v1964_v50 = vpop.permute.xlu0 %1963 }
 0x16f   : > { %v2146_v29 = vadd.f32 %v2145_v24, %v1949_v59  ;;  %v2147_v25 = vpop.f32.mrb[59].mxu0  ;;  %1760 = vmatprep.mubr.f32.mxu1 %v3615_v5 }
 0x170   : > { %v3111_v63 = vpack.c.bf16 %v2219_v12, %v2218_v36  ;;  %v2148_v62 = vadd.f32 %v2147_v25, %v1949_v59  ;;  %v1587_v12 = vld [vmem:[%s4865_s8 + $0x18] sm:$0xff] }
 0x171   : > { %v2220_v58 = vmax.f32 %v2146_v29, 0.0 }
 0x172   : > { %2678 = vst [vmem:[%s4524_s17 + $0x20] sm:$0xff] %v3111_v63  ;;  %v2221_v17 = vmax.f32 %v2148_v62, 0.0  ;;  %1761 = vmatmul.mubr.f32.vlgmr.msra.gmra.mrb[48].mxu1 %v1584_v46  ;;  %v2151_v30 = vpop.f32.mrb[60].mxu0  ;;  %v1969_v46 = vpop.permute.xlu1 %1968 }
 0x173   : > { %v2152_v34 = vadd.f32 %v2151_v30, %v1954_v21  ;;  %v2153_v9 = vpop.f32.mrb[61].mxu0  ;;  %1766 = vmatprep.mubr.f32.mxu1 %v3615_v5 }
 0x174   : > { %v3112_v11 = vpack.c.bf16 %v2221_v17, %v2220_v58  ;;  %v2154_v26 = vadd.f32 %v2153_v9, %v1954_v21  ;;  %v1588_v17 = vld [vmem:[%s4865_s8 + $0x20] sm:$0xff] }
 0x175   : > { %v2222_v48 = vmax.f32 %v2152_v34, 0.0 }
 0x176   : > { %2679 = vst [vmem:[%s4524_s17 + $0x28] sm:$0xff] %v3112_v11  ;;  %v2223_v27 = vmax.f32 %v2154_v26, 0.0  ;;  %1767 = vmatmul.mubr.f32.gmra.mrb[50].mxu1 %v1585_v38  ;;  %v2157_v20 = vpop.f32.mrb[62].mxu0  ;;  %v1974_v38 = vpop.permute.xlu0 %1973 }
 0x177   : > { %v2158_v23 = vadd.f32 %v2157_v20, %v1959_v31  ;;  %v2159_v44 = vpop.f32.mrb[63].mxu0  ;;  %1772 = vmatprep.mubr.f32.mxu1 %v3615_v5 }
 0x178   : > { %v3113_v39 = vpack.c.bf16 %v2223_v27, %v2222_v48  ;;  %v2160_v43 = vadd.f32 %v2159_v44, %v1959_v31  ;;  %v1589_v27 = vld [vmem:[%s4865_s8 + $0x28] sm:$0xff] }
 0x179   : > { %v2224_v8 = vmax.f32 %v2158_v23, 0.0 }
 0x17a   : > { %2680 = vst [vmem:[%s4524_s17 + $0x30] sm:$0xff] %v3113_v39  ;;  %v2225_v54 = vmax.f32 %v2160_v43, 0.0  ;;  %1773 = vmatmul.mubr.f32.gmra.mrb[52].mxu1 %v1586_v14  ;;  %v2163_v28 = vpop.f32.mrb[64].mxu0  ;;  %v1979_v14 = vpop.permute.xlu1 %1978 }
 0x17b   : > { %v2164_v36 = vadd.f32 %v2163_v28, %v1964_v50  ;;  %v2165_v59 = vpop.f32.mrb[65].mxu0  ;;  %1778 = vmatprep.mubr.f32.mxu1 %v3615_v5 }
 0x17c   : > { %v3114_v24 = vpack.c.bf16 %v2225_v54, %v2224_v8  ;;  %v2166_v29 = vadd.f32 %v2165_v59, %v1964_v50  ;;  %v1590_v54 = vld [vmem:[%s4865_s8 + $0x30] sm:$0xff] }
 0x17d   : > { %v2226_v25 = vmax.f32 %v2164_v36, 0.0 }
 0x17e   : > { %2681 = vst [vmem:[%s4524_s17 + $0x38] sm:$0xff] %v3114_v24  ;;  %v2227_v63 = vmax.f32 %v2166_v29, 0.0  ;;  %1779 = vmatmul.mubr.f32.gmra.mrb[54].mxu1 %v1587_v12  ;;  %v2169_v62 = vpop.f32.mrb[66].mxu0  ;;  %v1984_v12 = vpop.permute.xlu0 %1983 }
 0x17f   : > { %v2170_v58 = vadd.f32 %v2169_v62, %v1969_v46  ;;  %v2171_v21 = vpop.f32.mrb[67].mxu0  ;;  %1784 = vmatprep.mubr.f32.mxu1 %v3615_v5 }
 0x180   : > { %v3115_v30 = vpack.c.bf16 %v2227_v63, %v2226_v25  ;;  %v2172_v34 = vadd.f32 %v2171_v21, %v1969_v46  ;;  %v1591_v63 = vld [vmem:[%s4865_s8 + $0x38] sm:$0xff] }
 0x181   : > { %v2228_v9 = vmax.f32 %v2170_v58, 0.0 }
 0x182   : > { %2682 = vst [vmem:[%s4524_s17 + $0x40] sm:$0xff] %v3115_v30  ;;  %v2229_v11 = vmax.f32 %v2172_v34, 0.0  ;;  %1785 = vmatmul.mubr.f32.gmra.mrb[56].mxu1 %v1588_v17  ;;  %v2175_v26 = vpop.f32.mrb[68].mxu0  ;;  %v1989_v17 = vpop.permute.xlu1 %1988 }
 0x183   : > { %v2176_v48 = vadd.f32 %v2175_v26, %v1974_v38  ;;  %v2177_v31 = vpop.f32.mrb[69].mxu0  ;;  %1790 = vmatprep.mubr.f32.mxu1 %v3615_v5 }
 0x184   : > { %v3116_v20 = vpack.c.bf16 %v2229_v11, %v2228_v9  ;;  %v2178_v23 = vadd.f32 %v2177_v31, %v1974_v38  ;;  %v1592_v11 = vld [vmem:[%s4865_s8 + $0x40] sm:$0xff] }
 0x185   : > { %v2230_v44 = vmax.f32 %v2176_v48, 0.0 }
 0x186   : > { %2683 = vst [vmem:[%s4524_s17 + $0x48] sm:$0xff] %v3116_v20  ;;  %v2231_v39 = vmax.f32 %v2178_v23, 0.0  ;;  %1791 = vmatmul.mubr.f32.gmra.mrb[58].mxu1 %v1589_v27  ;;  %v2181_v43 = vpop.f32.mrb[70].mxu0  ;;  %v1994_v27 = vpop.permute.xlu0 %1993 }
 0x187   : > { %v2182_v8 = vadd.f32 %v2181_v43, %v1979_v14  ;;  %v2183_v50 = vpop.f32.mrb[71].mxu0  ;;  %1796 = vmatprep.mubr.f32.mxu1 %v3615_v5 }
 0x188   : > { %v3117_v28 = vpack.c.bf16 %v2231_v39, %v2230_v44  ;;  %v2184_v36 = vadd.f32 %v2183_v50, %v1979_v14  ;;  %v1593_v39 = vld [vmem:[%s4865_s8 + $0x48] sm:$0xff] }
 0x189   : > { %v2232_v59 = vmax.f32 %v2182_v8, 0.0 }
 0x18a   : > { %2684 = vst [vmem:[%s4524_s17 + $0x50] sm:$0xff] %v3117_v28  ;;  %v2233_v24 = vmax.f32 %v2184_v36, 0.0  ;;  %1797 = vmatmul.mubr.f32.gmra.mrb[60].mxu1 %v1590_v54  ;;  %v2187_v29 = vpop.f32.mrb[72].mxu0  ;;  %v1999_v54 = vpop.permute.xlu1 %1998 }
 0x18b   : > { %v2188_v25 = vadd.f32 %v2187_v29, %v1984_v12  ;;  %v2189_v46 = vpop.f32.mrb[73].mxu0  ;;  %1802 = vmatprep.mubr.f32.mxu1 %v3615_v5 }
 0x18c   : > { %v3118_v62 = vpack.c.bf16 %v2233_v24, %v2232_v59  ;;  %v2190_v58 = vadd.f32 %v2189_v46, %v1984_v12  ;;  %v1594_v24 = vld [vmem:[%s4865_s8 + $0x50] sm:$0xff] }
 0x18d   : > { %v2234_v21 = vmax.f32 %v2188_v25, 0.0 }
 0x18e   : > { %2685 = vst [vmem:[%s4524_s17 + $0x58] sm:$0xff] %v3118_v62  ;;  %v2235_v30 = vmax.f32 %v2190_v58, 0.0  ;;  %1803 = vmatmul.mubr.f32.gmra.mrb[62].mxu1 %v1591_v63  ;;  %v2193_v34 = vpop.f32.mrb[74].mxu0  ;;  %v1595_v62 = vld [vmem:[%s4865_s8 + $0x58] sm:$0xff] }
 0x18f   : > { %v2194_v9 = vadd.f32 %v2193_v34, %v1989_v17  ;;  %v2195_v38 = vpop.f32.mrb[75].mxu0  ;;  %1808 = vmatprep.mubr.f32.mxu1 %v3615_v5  ;;  %v1599_v34 = vld [vmem:[%s4865_s8 + $0x78] sm:$0xff] }
 0x190   : > { %v3119_v26 = vpack.c.bf16 %v2235_v30, %v2234_v21  ;;  %v2196_v48 = vadd.f32 %v2195_v38, %v1989_v17  ;;  %v1596_v21 = vld [vmem:[%s4865_s8 + $0x60] sm:$0xff]  ;;  %v1597_v17 = vld [vmem:[%s4865_s8 + $0x68] sm:$0xff]  ;;  %v1598_v30 = vld [vmem:[%s4865_s8 + $0x70] sm:$0xff] }
 0x191   : > { %v2236_v31 = vmax.f32 %v2194_v9, 0.0 }
 0x192   : > { %2686 = vst [vmem:[%s4524_s17 + $0x60] sm:$0xff] %v3119_v26  ;;  %v2237_v20 = vmax.f32 %v2196_v48, 0.0  ;;  %1809 = vmatmul.mubr.f32.gmra.mrb[64].mxu1 %v1592_v11  ;;  %v2199_v23 = vpop.f32.mrb[76].mxu0 }
 0x193   : > { %v2200_v44 = vadd.f32 %v2199_v23, %v1994_v27  ;;  %v2201_v14 = vpop.f32.mrb[77].mxu0  ;;  %1814 = vmatprep.mubr.f32.mxu1 %v3615_v5 }
 0x194   : > { %v3120_v43 = vpack.c.bf16 %v2237_v20, %v2236_v31  ;;  %v2202_v8 = vadd.f32 %v2201_v14, %v1994_v27 }
 0x195   : > { %v2238_v50 = vmax.f32 %v2200_v44, 0.0 }
 0x196   : > { %2687 = vst [vmem:[%s4524_s17 + $0x68] sm:$0xff] %v3120_v43  ;;  %v2239_v28 = vmax.f32 %v2202_v8, 0.0  ;;  %1815 = vmatmul.mubr.f32.gmra.mrb[66].mxu1 %v1593_v39  ;;  %v2205_v36 = vpop.f32.mrb[78].mxu0 }
 0x197   : > { %v2206_v59 = vadd.f32 %v2205_v36, %v1999_v54  ;;  %v2207_v12 = vpop.f32.mrb[79].mxu0  ;;  %1820 = vmatprep.mubr.f32.mxu1 %v3615_v5 }
 0x198   : > { %v3121_v29 = vpack.c.bf16 %v2239_v28, %v2238_v50  ;;  %v2208_v25 = vadd.f32 %v2207_v12, %v1999_v54 }
 0x199   : > { %v2240_v46 = vmax.f32 %v2206_v59, 0.0 }
 0x19a   : > { %2688 = vst [vmem:[%s4524_s17 + $0x70] sm:$0xff] %v3121_v29  ;;  %v2241_v63 = vmax.f32 %v2208_v25, 0.0  ;;  %1821 = vmatmul.mubr.f32.gmra.mrb[68].mxu1 %v1594_v24 }
 0x19b   : > { %1826 = vmatprep.mubr.f32.mxu1 %v3615_v5 }
 0x19c   : > { %v3122_v58 = vpack.c.bf16 %v2241_v63, %v2240_v46 }
 0x19e   : > { %2689 = vst [vmem:[%s4524_s17 + $0x78] sm:$0xff] %v3122_v58  ;;  %1827 = vmatmul.mubr.f32.gmra.mrb[70].mxu1 %v1595_v62 }
 0x19f   : > { %1832 = vmatprep.mubr.f32.mxu1 %v3615_v5 }
 0x1a2   : > { %1833 = vmatmul.mubr.f32.gmra.mrb[72].mxu1 %v1596_v21 }
 0x1a3   : > { %1838 = vmatprep.mubr.f32.mxu1 %v3615_v5 }
 0x1a6   : > { %1839 = vmatmul.mubr.f32.gmra.mrb[74].mxu1 %v1597_v17 }
 0x1a7   : > { %1844 = vmatprep.mubr.f32.mxu1 %v3615_v5 }
 0x1aa   : > { %1845 = vmatmul.mubr.f32.gmra.mrb[76].mxu1 %v1598_v30 }
 0x1ab   : > { %1850 = vmatprep.mubr.f32.mxu1 %v3615_v5 }
 0x1ae   : > { %1851 = vmatmul.mubr.f32.gmra.mrb[78].mxu1 %v1599_v34 }
 0x205   : > { %v1098_v9 = vpop.f32.mrb[16].mxu1 }
 0x206   : > { %v1099_v38 = vadd.f32 %v1098_v9, %v4324_v40  ;;  %v1100_v11 = vpop.f32.mrb[17].mxu1 }
 0x207   : > { %v1101_v26 = vadd.f32 %v1100_v11, %v4324_v40 }
 0x208   : > { %v1193_v48 = vmax.f32 %v1099_v38, 0.0 }
 0x209   : > { %v1194_v31 = vmax.f32 %v1101_v26, 0.0  ;;  %v1104_v27 = vpop.f32.mrb[18].mxu1 }
 0x20a   : > { %v1105_v20 = vadd.f32 %v1104_v27, %v4326_v41  ;;  %v1106_v23 = vpop.f32.mrb[19].mxu1 }
 0x20b   : > { %v3360_v44 = vpack.i.bf16 %v1194_v31, %v1193_v48  ;;  %v1107_v5 = vadd.f32 %v1106_v23, %v4326_v41 }
 0x20c   : > { %v1195_v14 = vmax.f32 %v1105_v20, 0.0 }
 0x20d   : > { %v1196_v39 = vmax.f32 %v1107_v5, 0.0  ;;  %v1110_v43 = vpop.f32.mrb[20].mxu1  ;;  %3361 = vxpose.xlu0.b32.start [1/16] %v3360_v44, 128 }
 0x20e   : > { %v1111_v8 = vadd.f32 %v1110_v43, %v4328_v42  ;;  %v1112_v50 = vpop.f32.mrb[21].mxu1 }
 0x20f   : > { %v3362_v54 = vpack.i.bf16 %v1196_v39, %v1195_v14  ;;  %v1113_v28 = vadd.f32 %v1112_v50, %v4328_v42 }
 0x210   : > { %v1197_v40 = vmax.f32 %v1111_v8, 0.0 }
 0x211   : > { %v1198_v36 = vmax.f32 %v1113_v28, 0.0  ;;  %v1116_v59 = vpop.f32.mrb[22].mxu1  ;;  %3363 = vxpose.xlu0.b32.cont [2/16] %v3362_v54, 128 }
 0x212   : > { %v1117_v12 = vadd.f32 %v1116_v59, %v4332_v51  ;;  %v1118_v24 = vpop.f32.mrb[23].mxu1 }
 0x213   : > { %v3364_v29 = vpack.i.bf16 %v1198_v36, %v1197_v40  ;;  %v1119_v41 = vadd.f32 %v1118_v24, %v4332_v51 }
 0x214   : > { %v1199_v25 = vmax.f32 %v1117_v12, 0.0 }
 0x215   : > { %v1200_v46 = vmax.f32 %v1119_v41, 0.0  ;;  %v1122_v63 = vpop.f32.mrb[24].mxu1  ;;  %3365 = vxpose.xlu0.b32.cont [3/16] %v3364_v29, 128 }
 0x216   : > { %v1123_v62 = vadd.f32 %v1122_v63, %v4340_v7  ;;  %v1124_v58 = vpop.f32.mrb[25].mxu1 }
 0x217   : > { %v3366_v21 = vpack.i.bf16 %v1200_v46, %v1199_v25  ;;  %v1125_v42 = vadd.f32 %v1124_v58, %v4340_v7 }
 0x218   : > { %v1201_v17 = vmax.f32 %v1123_v62, 0.0 }
 0x219   : > { %v1202_v30 = vmax.f32 %v1125_v42, 0.0  ;;  %v1128_v34 = vpop.f32.mrb[26].mxu1  ;;  %3367 = vxpose.xlu0.b32.cont [4/16] %v3366_v21, 128 }
 0x21a   : > { %v1129_v9 = vadd.f32 %v1128_v34, %v4348_v49  ;;  %v1130_v38 = vpop.f32.mrb[27].mxu1 }
 0x21b   : > { %v3368_v11 = vpack.i.bf16 %v1202_v30, %v1201_v17  ;;  %v1131_v51 = vadd.f32 %v1130_v38, %v4348_v49 }
 0x21c   : > { %v1203_v26 = vmax.f32 %v1129_v9, 0.0 }
 0x21d   : > { %v1204_v48 = vmax.f32 %v1131_v51, 0.0  ;;  %v1134_v31 = vpop.f32.mrb[28].mxu1  ;;  %3369 = vxpose.xlu0.b32.cont [5/16] %v3368_v11, 128 }
 0x21e   : > { %v1135_v27 = vadd.f32 %v1134_v31, %v4356_v6  ;;  %v1136_v20 = vpop.f32.mrb[29].mxu1 }
 0x21f   : > { %v3370_v23 = vpack.i.bf16 %v1204_v48, %v1203_v26  ;;  %v1137_v7 = vadd.f32 %v1136_v20, %v4356_v6 }
 0x220   : > { %v1205_v44 = vmax.f32 %v1135_v27, 0.0 }
 0x221   : > { %v1206_v5 = vmax.f32 %v1137_v7, 0.0  ;;  %v1140_v14 = vpop.f32.mrb[30].mxu1  ;;  %3371 = vxpose.xlu0.b32.cont [6/16] %v3370_v23, 128 }
 0x222   : > { %v1141_v39 = vadd.f32 %v1140_v14, %v4362_v52  ;;  %v1142_v43 = vpop.f32.mrb[31].mxu1 }
 0x223   : > { %v3372_v8 = vpack.i.bf16 %v1206_v5, %v1205_v44  ;;  %v1143_v49 = vadd.f32 %v1142_v43, %v4362_v52 }
 0x224   : > { %v1207_v50 = vmax.f32 %v1141_v39, 0.0 }
 0x225   : > { %v1208_v54 = vmax.f32 %v1143_v49, 0.0  ;;  %v1146_v28 = vpop.f32.mrb[32].mxu1  ;;  %3373 = vxpose.xlu0.b32.cont [7/16] %v3372_v8, 128 }
 0x226   : > { %v1147_v40 = vadd.f32 %v1146_v28, %v4372_v2  ;;  %v1148_v36 = vpop.f32.mrb[33].mxu1 }
 0x227   : > { %v3374_v59 = vpack.i.bf16 %v1208_v54, %v1207_v50  ;;  %v1149_v6 = vadd.f32 %v1148_v36, %v4372_v2 }
 0x228   : > { %v1209_v12 = vmax.f32 %v1147_v40, 0.0 }
 0x229   : > { %v1210_v24 = vmax.f32 %v1149_v6, 0.0  ;;  %v1152_v29 = vpop.f32.mrb[34].mxu1  ;;  %3375 = vxpose.xlu0.b32.cont [8/16] %v3374_v59, 128 }
 0x22a   : > { %v1153_v41 = vadd.f32 %v1152_v29, %v4376_v19  ;;  %v1154_v25 = vpop.f32.mrb[35].mxu1 }
 0x22b   : > { %v3376_v46 = vpack.i.bf16 %v1210_v24, %v1209_v12  ;;  %v1155_v52 = vadd.f32 %v1154_v25, %v4376_v19 }
 0x22c   : > { %v1211_v63 = vmax.f32 %v1153_v41, 0.0 }
 0x22d   : > { %v1212_v62 = vmax.f32 %v1155_v52, 0.0  ;;  %v1158_v58 = vpop.f32.mrb[36].mxu1  ;;  %3377 = vxpose.xlu0.b32.cont [9/16] %v3376_v46, 128 }
 0x22e   : > { %v1159_v21 = vadd.f32 %v1158_v58, %v4384_v61  ;;  %v1160_v42 = vpop.f32.mrb[37].mxu1 }
 0x22f   : > { %v3378_v17 = vpack.i.bf16 %v1212_v62, %v1211_v63  ;;  %v1161_v2 = vadd.f32 %v1160_v42, %v4384_v61 }
 0x230   : > { %v1213_v30 = vmax.f32 %v1159_v21, 0.0 }
 0x231   : > { %v1214_v34 = vmax.f32 %v1161_v2, 0.0  ;;  %v1164_v9 = vpop.f32.mrb[38].mxu1  ;;  %3379 = vxpose.xlu0.b32.cont [10/16] %v3378_v17, 128 }
 0x232   : > { %v1165_v38 = vadd.f32 %v1164_v9, %v4388_v16  ;;  %v1166_v11 = vpop.f32.mrb[39].mxu1 }
 0x233   : > { %v3380_v51 = vpack.i.bf16 %v1214_v34, %v1213_v30  ;;  %v1167_v19 = vadd.f32 %v1166_v11, %v4388_v16 }
 0x234   : > { %v1215_v26 = vmax.f32 %v1165_v38, 0.0 }
 0x235   : > { %v1216_v48 = vmax.f32 %v1167_v19, 0.0  ;;  %v1170_v31 = vpop.f32.mrb[40].mxu1  ;;  %3381 = vxpose.xlu0.b32.cont [11/16] %v3380_v51, 128 }
 0x236   : > { %v1171_v27 = vadd.f32 %v1170_v31, %v4391_v57  ;;  %v1172_v20 = vpop.f32.mrb[41].mxu1 }
 0x237   : > { %v3382_v23 = vpack.i.bf16 %v1216_v48, %v1215_v26  ;;  %v1173_v61 = vadd.f32 %v1172_v20, %v4391_v57 }
 0x238   : > { %v1217_v7 = vmax.f32 %v1171_v27, 0.0 }
 0x239   : > { %v1218_v44 = vmax.f32 %v1173_v61, 0.0  ;;  %v1176_v5 = vpop.f32.mrb[42].mxu1  ;;  %3383 = vxpose.xlu0.b32.cont [12/16] %v3382_v23, 128 }
 0x23a   : > { %v1177_v14 = vadd.f32 %v1176_v5, %v4397_v55  ;;  %v1178_v39 = vpop.f32.mrb[43].mxu1 }
 0x23b   : > { %v3384_v43 = vpack.i.bf16 %v1218_v44, %v1217_v7  ;;  %v1179_v16 = vadd.f32 %v1178_v39, %v4397_v55 }
 0x23c   : > { %v1219_v8 = vmax.f32 %v1177_v14, 0.0 }
 0x23d   : > { %v1220_v49 = vmax.f32 %v1179_v16, 0.0  ;;  %v1182_v50 = vpop.f32.mrb[44].mxu1  ;;  %3385 = vxpose.xlu0.b32.cont [13/16] %v3384_v43, 128 }
 0x23e   : > { %v1183_v54 = vadd.f32 %v1182_v50, %v4400_v1  ;;  %v1184_v28 = vpop.f32.mrb[45].mxu1 }
 0x23f   : > { %v3386_v40 = vpack.i.bf16 %v1220_v49, %v1219_v8  ;;  %v1185_v57 = vadd.f32 %v1184_v28, %v4400_v1 }
 0x240   : > { %v1221_v36 = vmax.f32 %v1183_v54, 0.0 }
 0x241   : > { %v1222_v59 = vmax.f32 %v1185_v57, 0.0  ;;  %v1188_v6 = vpop.f32.mrb[46].mxu1  ;;  %3387 = vxpose.xlu0.b32.cont [14/16] %v3386_v40, 128 }
 0x242   : > { %v1189_v12 = vadd.f32 %v1188_v6, %v4407_v4  ;;  %v1190_v24 = vpop.f32.mrb[47].mxu1 }
 0x243   : > { %v3388_v29 = vpack.i.bf16 %v1222_v59, %v1221_v36  ;;  %v1191_v55 = vadd.f32 %v1190_v24, %v4407_v4 }
 0x244   : > { %v1223_v41 = vmax.f32 %v1189_v12, 0.0 }
 0x245   : > { %v1224_v25 = vmax.f32 %v1191_v55, 0.0  ;;  %v1762_v46 = vpop.f32.mrb[48].mxu1  ;;  %3389 = vxpose.xlu0.b32.cont [15/16] %v3388_v29, 128 }
 0x246   : > { %v1763_v52 = vadd.f32 %v1762_v46, %v4410_v47  ;;  %v1764_v63 = vpop.f32.mrb[49].mxu1 }
 0x247   : > { %v3390_v62 = vpack.i.bf16 %v1224_v25, %v1223_v41  ;;  %v1765_v1 = vadd.f32 %v1764_v63, %v4410_v47 }
 0x248   : > { %v1857_v58 = vmax.f32 %v1763_v52, 0.0 }
 0x249   : > { %v1858_v21 = vmax.f32 %v1765_v1, 0.0  ;;  %v1768_v42 = vpop.f32.mrb[50].mxu1  ;;  %3391 = vxpose.xlu0.b32.end [16/16] %v3390_v62, 128 }
 0x24a   : > { %v1769_v17 = vadd.f32 %v1768_v42, %v4414_v0  ;;  %v1770_v2 = vpop.f32.mrb[51].mxu1 }
 0x24b   : > { %v3091_v30 = vpack.c.bf16 %v1858_v21, %v1857_v58  ;;  %v1771_v4 = vadd.f32 %v1770_v2, %v4414_v0 }
 0x24c   : > { %v1859_v34 = vmax.f32 %v1769_v17, 0.0 }
 0x24d   : > { %2562 = vst [vmem:[%s4655_s27] sm:$0xff] %v3091_v30  ;;  %v1860_v9 = vmax.f32 %v1771_v4, 0.0  ;;  %v1774_v38 = vpop.f32.mrb[52].mxu1 }
 0x24e   : > { %v1775_v47 = vadd.f32 %v1774_v38, %v4421_v45  ;;  %v1776_v11 = vpop.f32.mrb[53].mxu1 }
 0x24f   : > { %v3092_v51 = vpack.c.bf16 %v1860_v9, %v1859_v34  ;;  %v1777_v19 = vadd.f32 %v1776_v11, %v4421_v45 }
 0x250   : > { %v1861_v26 = vmax.f32 %v1775_v47, 0.0 }
 0x251   : > { %2563 = vst [vmem:[%s4655_s27 + $0x8] sm:$0xff] %v3092_v51  ;;  %v1862_v48 = vmax.f32 %v1777_v19, 0.0  ;;  %v1780_v0 = vpop.f32.mrb[54].mxu1 }
 0x252   : > { %v1781_v31 = vadd.f32 %v1780_v0, %v4428_v60  ;;  %v1782_v27 = vpop.f32.mrb[55].mxu1 }
 0x253   : > { %v3093_v20 = vpack.c.bf16 %v1862_v48, %v1861_v26  ;;  %v1783_v23 = vadd.f32 %v1782_v27, %v4428_v60 }
 0x254   : > { %v1863_v61 = vmax.f32 %v1781_v31, 0.0 }
 0x255   : > { %2564 = vst [vmem:[%s4655_s27 + $0x10] sm:$0xff] %v3093_v20  ;;  %v1864_v7 = vmax.f32 %v1783_v23, 0.0  ;;  %v1786_v44 = vpop.f32.mrb[56].mxu1 }
 0x256   : > { %v1787_v5 = vadd.f32 %v1786_v44, %v4431_v10  ;;  %v1788_v14 = vpop.f32.mrb[57].mxu1 }
 0x257   : > { %v3094_v45 = vpack.c.bf16 %v1864_v7, %v1863_v61  ;;  %v1789_v39 = vadd.f32 %v1788_v14, %v4431_v10 }
 0x258   : > { %v1865_v43 = vmax.f32 %v1787_v5, 0.0 }
 0x259   : > { %2565 = vst [vmem:[%s4655_s27 + $0x18] sm:$0xff] %v3094_v45  ;;  %v1866_v16 = vmax.f32 %v1789_v39, 0.0  ;;  %v1792_v8 = vpop.f32.mrb[58].mxu1 }
 0x25a   : > { %v1793_v49 = vadd.f32 %v1792_v8, %v4440_v3  ;;  %v1794_v50 = vpop.f32.mrb[59].mxu1 }
 0x25b   : > { %v3095_v60 = vpack.c.bf16 %v1866_v16, %v1865_v43  ;;  %v1795_v54 = vadd.f32 %v1794_v50, %v4440_v3 }
 0x25c   : > { %v1867_v28 = vmax.f32 %v1793_v49, 0.0 }
 0x25d   : > { %2566 = vst [vmem:[%s4655_s27 + $0x20] sm:$0xff] %v3095_v60  ;;  %v1868_v40 = vmax.f32 %v1795_v54, 0.0  ;;  %v1798_v57 = vpop.f32.mrb[60].mxu1 }
 0x25e   : > { %v1799_v36 = vadd.f32 %v1798_v57, %v4446_v13  ;;  %v1800_v59 = vpop.f32.mrb[61].mxu1 }
 0x25f   : > { %v3096_v10 = vpack.c.bf16 %v1868_v40, %v1867_v28  ;;  %v1801_v6 = vadd.f32 %v1800_v59, %v4446_v13 }
 0x260   : > { %v1869_v12 = vmax.f32 %v1799_v36, 0.0 }
 0x261   : > { %2567 = vst [vmem:[%s4655_s27 + $0x28] sm:$0xff] %v3096_v10  ;;  %v1870_v24 = vmax.f32 %v1801_v6, 0.0  ;;  %v1804_v29 = vpop.f32.mrb[62].mxu1 }
 0x262   : > { %v1805_v55 = vadd.f32 %v1804_v29, %v4455_v15  ;;  %v1806_v41 = vpop.f32.mrb[63].mxu1 }
 0x263   : > { %v3097_v3 = vpack.c.bf16 %v1870_v24, %v1869_v12  ;;  %v1807_v25 = vadd.f32 %v1806_v41, %v4455_v15 }
 0x264   : > { %v1871_v46 = vmax.f32 %v1805_v55, 0.0 }
 0x265   : > { %2568 = vst [vmem:[%s4655_s27 + $0x30] sm:$0xff] %v3097_v3  ;;  %v1872_v52 = vmax.f32 %v1807_v25, 0.0  ;;  %v1810_v63 = vpop.f32.mrb[64].mxu1 }
 0x266   : > { %v1811_v62 = vadd.f32 %v1810_v63, %v4458_v32  ;;  %v1812_v1 = vpop.f32.mrb[65].mxu1 }
 0x267   : > { %v3098_v13 = vpack.c.bf16 %v1872_v52, %v1871_v46  ;;  %v1813_v58 = vadd.f32 %v1812_v1, %v4458_v32 }
 0x268   : > { %v1873_v21 = vmax.f32 %v1811_v62, 0.0 }
 0x269   : > { %2569 = vst [vmem:[%s4655_s27 + $0x38] sm:$0xff] %v3098_v13  ;;  %v1874_v42 = vmax.f32 %v1813_v58, 0.0  ;;  %v1816_v17 = vpop.f32.mrb[66].mxu1 }
 0x26a   : > { %v1817_v2 = vadd.f32 %v1816_v17, %v4465_v33  ;;  %v1818_v30 = vpop.f32.mrb[67].mxu1 }
 0x26b   : > { %v3099_v15 = vpack.c.bf16 %v1874_v42, %v1873_v21  ;;  %v1819_v4 = vadd.f32 %v1818_v30, %v4465_v33 }
 0x26c   : > { %v1875_v34 = vmax.f32 %v1817_v2, 0.0 }
 0x26d   : > { %2570 = vst [vmem:[%s4655_s27 + $0x40] sm:$0xff] %v3099_v15  ;;  %v1876_v9 = vmax.f32 %v1819_v4, 0.0  ;;  %v1822_v38 = vpop.f32.mrb[68].mxu1 }
 0x26e   : > { %v1823_v47 = vadd.f32 %v1822_v38, %v4473_v22  ;;  %v1824_v11 = vpop.f32.mrb[69].mxu1 }
 0x26f   : > { %v3100_v32 = vpack.c.bf16 %v1876_v9, %v1875_v34  ;;  %v1825_v51 = vadd.f32 %v1824_v11, %v4473_v22 }
 0x270   : > { %v1877_v19 = vmax.f32 %v1823_v47, 0.0 }
 0x271   : > { %2571 = vst [vmem:[%s4655_s27 + $0x48] sm:$0xff] %v3100_v32  ;;  %v1878_v26 = vmax.f32 %v1825_v51, 0.0  ;;  %v1828_v48 = vpop.f32.mrb[70].mxu1 }
 0x272   : > { %v1829_v0 = vadd.f32 %v1828_v48, %v4480_v18  ;;  %v1830_v31 = vpop.f32.mrb[71].mxu1 }
 0x273   : > { %v3101_v33 = vpack.c.bf16 %v1878_v26, %v1877_v19  ;;  %v1831_v27 = vadd.f32 %v1830_v31, %v4480_v18 }
 0x274   : > { %v1879_v20 = vmax.f32 %v1829_v0, 0.0 }
 0x275   : > { %2572 = vst [vmem:[%s4655_s27 + $0x50] sm:$0xff] %v3101_v33  ;;  %v1880_v23 = vmax.f32 %v1831_v27, 0.0  ;;  %v1834_v61 = vpop.f32.mrb[72].mxu1 }
 0x276   : > { %v1835_v7 = vadd.f32 %v1834_v61, %v4483_v35  ;;  %v1836_v44 = vpop.f32.mrb[73].mxu1 }
 0x277   : > { %v3102_v22 = vpack.c.bf16 %v1880_v23, %v1879_v20  ;;  %v1837_v5 = vadd.f32 %v1836_v44, %v4483_v35 }
 0x278   : > { %v1881_v14 = vmax.f32 %v1835_v7, 0.0 }
 0x279   : > { %2573 = vst [vmem:[%s4655_s27 + $0x58] sm:$0xff] %v3102_v22  ;;  %v1882_v45 = vmax.f32 %v1837_v5, 0.0  ;;  %v1840_v39 = vpop.f32.mrb[74].mxu1 }
 0x27a   : > { %v1841_v43 = vadd.f32 %v1840_v39, %v4492_v56  ;;  %v1842_v16 = vpop.f32.mrb[75].mxu1 }
 0x27b   : > { %v3103_v18 = vpack.c.bf16 %v1882_v45, %v1881_v14  ;;  %v1843_v8 = vadd.f32 %v1842_v16, %v4492_v56 }
 0x27c   : > { %v1883_v49 = vmax.f32 %v1841_v43, 0.0 }
 0x27d   : > { %2574 = vst [vmem:[%s4655_s27 + $0x60] sm:$0xff] %v3103_v18  ;;  %v1884_v50 = vmax.f32 %v1843_v8, 0.0  ;;  %v1846_v60 = vpop.f32.mrb[76].mxu1 }
 0x27e   : > { %v1847_v35 = vadd.f32 %v1846_v60, %v4499_v37  ;;  %v1848_v54 = vpop.f32.mrb[77].mxu1 }
 0x27f   : > { %v3104_v28 = vpack.c.bf16 %v1884_v50, %v1883_v49  ;;  %v1849_v40 = vadd.f32 %v1848_v54, %v4499_v37 }
 0x280   : > { %v1885_v57 = vmax.f32 %v1847_v35, 0.0 }
 0x281   : > { %2575 = vst [vmem:[%s4655_s27 + $0x68] sm:$0xff] %v3104_v28  ;;  %v1886_v36 = vmax.f32 %v1849_v40, 0.0  ;;  %v1852_v59 = vpop.f32.mrb[78].mxu1 }
 0x282   : > { %v1853_v56 = vadd.f32 %v1852_v59, %v4507_v53  ;;  %v1854_v10 = vpop.f32.mrb[79].mxu1 }
 0x283   : > { %v3105_v6 = vpack.c.bf16 %v1886_v36, %v1885_v57  ;;  %v1855_v12 = vadd.f32 %v1854_v10, %v4507_v53 }
 0x284   : > { %v1887_v37 = vmax.f32 %v1853_v56, 0.0 }
 0x285   : > { %2576 = vst [vmem:[%s4655_s27 + $0x70] sm:$0xff] %v3105_v6  ;;  %v1888_v24 = vmax.f32 %v1855_v12, 0.0 }
 0x287   : > { %v3106_v29 = vpack.c.bf16 %v1888_v24, %v1887_v37 }
 0x289   : > { %2577 = vst [vmem:[%s4655_s27 + $0x78] sm:$0xff] %v3106_v29 }
 0x28a   : > { %3487 = shalt.err (!%p3484_p5)
}
 0x28b   : > { %s3488_s26 = scalar_lea.hbm %s4713_s24, 2048  ;;  %s3492_s28 = scalar_lea.hbm %s4870_s13, 4096 }
 0x28c   : > { %p3489_p6 = scmp.ne.s32.totalorder %s4713_s24, %s3488_s26  ;;  %p3493_p10 = scmp.lt.u32.totalorder %s4713_s24, %s4870_s13 }
 0x28d   : > { %p3494_p11 = scmp.lt.u32.totalorder %s3492_s28, %s3488_s26  ;;  %p3496_p13 = scmp.lt.u32.totalorder %s3488_s26, %s4713_s24 }
 0x28e   : > { %p3490_p7 = pnand %p3489_p6, %p3740_p4 }
 0x28f   : > { %p3495_p12 = por %p3494_p11, %p3493_p10 }
 0x290   : > { %p3491_p9 = pneg %p3490_p7 }
 0x291   : > { %p3497_p0 = por %p3496_p13, %p3495_p12 }
 0x293   : > { %p3498_p1 = pnand %p3497_p0, %p3491_p9 }
 0x295   : > { %3501 = shalt.err (!%p3498_p1)
}
 0x296   : > { %s3617_s0 = smov 128   ;;  %s3618_s1 = smov 8  }
 0x297   : > { %s4893_s17 = scalar_lea.sflag [#allocation5], %s4700_s25  ;;  %s3502_s26 = scalar_lea.vmem %s4723_s20, 2048 }
 0x298   : > { %3288 = dma.vmem_to_hbm [thread:$0]  (%p3740_p4), %s4715_s29, 2048, %s4713_s24, %s4893_s17, %s3617_s0, %s3617_s0, %s3618_s1  }
 0x299   : > { %p3503_p2 = scmp.ne.s32.totalorder %s4723_s20, %s3502_s26  ;;  %s3619_s27 = smov [#allocation6]  }
 0x29a   : > { %s3506_s15 = sshll.u32 %s3619_s27, 4  ;;  %s3507_s15 = int_to_ptr.vmem [resolvable:$false] %s3506_s15 }
 0x29b   : > { %p3504_p3 = pnand %p3503_p2, %p3740_p4  ;;  %s3508_s28 = scalar_lea.vmem %s3507_s15, 4096 }
 0x29c   : > { %p3509_p6 = scmp.lt.s32.totalorder %s4723_s20, %s3507_s15  ;;  %p3510_p7 = scmp.lt.s32.totalorder %s3508_s28, %s3502_s26 }
 0x29d   : > { %p3505_p5 = pneg %p3504_p3 }
 0x29e   : > { %p3511_p9 = por %p3510_p7, %p3509_p6 }
 0x2a0   : > { %p3512_p10 = pnand %p3511_p9, %p3505_p5 }
 0x2a2   : > { %3515 = shalt.err (!%p3512_p10)
}
 0x2a3   : > { %s3516_s29 = scalar_lea.hbm %s4721_s16, 2048  ;;  %s3520_s17 = scalar_lea.hbm %s4871_s14, 4096 }
 0x2a4   : > { %p3517_p11 = scmp.ne.s32.totalorder %s4721_s16, %s3516_s29  ;;  %p3521_p0 = scmp.lt.u32.totalorder %s4721_s16, %s4871_s14 }
 0x2a5   : > { %p3522_p1 = scmp.lt.u32.totalorder %s3520_s17, %s3516_s29  ;;  %p3524_p3 = scmp.lt.u32.totalorder %s3516_s29, %s4721_s16 }
 0x2a6   : > { %p3518_p12 = pnand %p3517_p11, %p3740_p4 }
 0x2a7   : > { %p3523_p2 = por %p3522_p1, %p3521_p0 }
 0x2a8   : > { %p3519_p13 = pneg %p3518_p12 }
 0x2a9   : > { %p3525_p5 = por %p3524_p3, %p3523_p2 }
 0x2ab   : > { %p3526_p6 = pnand %p3525_p5, %p3519_p13 }
 0x2ad   : > { %3529 = shalt.err (!%p3526_p6)
}
 0x2ae   : > { %s4894_s26 = scalar_lea.sflag [#allocation5], %s4700_s25  ;;  %v3392_v53 = vpop.trf.xlu0  ;;  %s4780_s28 = scalar_lea.vmem [#allocation2], %s4517_s19 }
 0x2af   : > { %3289 = dma.vmem_to_hbm [thread:$0]  (%p3740_p4), %s4723_s20, 2048, %s4721_s16, %s4894_s26, %s3617_s0, %s3617_s0, %s3618_s1   ;;  %v3396_v55 = vunpack.i.h.bf16 %v3392_v53  ;;  %v3393_v41 = vunpack.i.l.bf16 %v3392_v53 }
 0x2b0   : > { %s2716_s19 = sshll.u32 %s4780_s28, 4  ;;  %s4801_s16 = scalar_lea.hbm %s4869_s12, %s4704_s22  ;;  %s4803_s19 = int_to_ptr.vmem [resolvable:$true] %s2716_s19 }
 0x2b1   : > { %s4895_s0 = sand.u32 1, %s3596_s30   ;;  %s3530_s29 = scalar_lea.vmem %s4803_s19, 2048 }
 0x2b2   : > { %v3397_v3 = vpop.trf.xlu0  ;;  %s4809_s1 = scalar_lea.sflag [#allocation3], %s4895_s0  ;;  %p3531_p7 = scmp.ne.s32.totalorder %s4803_s19, %s3530_s29 }
 0x2b3   : > { %v3401_v25 = vunpack.i.h.bf16 %v3397_v3  ;;  %v3398_v46 = vunpack.i.l.bf16 %v3397_v3  ;;  %s3620_s24 = smov [#allocation2]  }
 0x2b4   : > { %p3532_p9 = pnand %p3531_p7, %p3740_p4  ;;  %s3534_s22 = sshll.u32 %s3620_s24, 4  ;;  %s3535_s22 = int_to_ptr.vmem [resolvable:$false] %s3534_s22 }
 0x2b5   : > { %v3129_v52 = vpack.c.bf16 %v3398_v46, %v3393_v41  ;;  %v3169_v63 = vpack.c.bf16 %v3401_v25, %v3396_v55  ;;  %s3536_s21 = scalar_lea.vmem %s3535_s22, 4096  ;;  %p3537_p11 = scmp.lt.s32.totalorder %s4803_s19, %s3535_s22 }
 0x2b6   : > { %v3402_v62 = vpop.trf.xlu0  ;;  %p3533_p10 = pneg %p3532_p9  ;;  %p3538_p12 = scmp.lt.s32.totalorder %s3536_s21, %s3530_s29 }
 0x2b7   : > { %3130 = vst [vmem:[%s4780_s28] sm:$0xff] %v3129_v52   ;;  %3213 = vst [vmem:[%s4780_s28 + $0x40] sm:$0xff] %v3169_v63   ;;  %v3406_v1 = vunpack.i.h.bf16 %v3402_v62  ;;  %v3403_v13 = vunpack.i.l.bf16 %v3402_v62 }
 0x2b8   : > { %p3539_p13 = por %p3538_p12, %p3537_p11 }
 0x2ba   : > { %v3407_v58 = vpop.trf.xlu0  ;;  %p3540_p0 = pnand %p3539_p13, %p3533_p10 }
 0x2bb   : > { %v3411_v21 = vunpack.i.h.bf16 %v3407_v58  ;;  %v3408_v42 = vunpack.i.l.bf16 %v3407_v58 }
 0x2bd   : > { %v3134_v17 = vpack.c.bf16 %v3408_v42, %v3403_v13  ;;  %v3174_v2 = vpack.c.bf16 %v3411_v21, %v3406_v1 }
 0x2be   : > { %v3412_v30 = vpop.trf.xlu0 }
 0x2bf   : > { %3206 = vst [vmem:[%s4780_s28 + $0x8] sm:$0xff] %v3134_v17   ;;  %3214 = vst [vmem:[%s4780_s28 + $0x48] sm:$0xff] %v3174_v2   ;;  %v3416_v15 = vunpack.i.h.bf16 %v3412_v30  ;;  %v3413_v4 = vunpack.i.l.bf16 %v3412_v30 }
 0x2c2   : > { %v3417_v34 = vpop.trf.xlu0 }
 0x2c3   : > { %v3421_v9 = vunpack.i.h.bf16 %v3417_v34  ;;  %v3418_v38 = vunpack.i.l.bf16 %v3417_v34 }
 0x2c5   : > { %v3139_v47 = vpack.c.bf16 %v3418_v38, %v3413_v4  ;;  %v3179_v11 = vpack.c.bf16 %v3421_v9, %v3416_v15 }
 0x2c6   : > { %v3422_v32 = vpop.trf.xlu0 }
 0x2c7   : > { %3207 = vst [vmem:[%s4780_s28 + $0x10] sm:$0xff] %v3139_v47   ;;  %3215 = vst [vmem:[%s4780_s28 + $0x50] sm:$0xff] %v3179_v11   ;;  %v3426_v51 = vunpack.i.h.bf16 %v3422_v32  ;;  %v3423_v19 = vunpack.i.l.bf16 %v3422_v32 }
 0x2ca   : > { %v3427_v26 = vpop.trf.xlu0 }
 0x2cb   : > { %v3431_v48 = vunpack.i.h.bf16 %v3427_v26  ;;  %v3428_v0 = vunpack.i.l.bf16 %v3427_v26 }
 0x2cd   : > { %v3144_v31 = vpack.c.bf16 %v3428_v0, %v3423_v19  ;;  %v3184_v33 = vpack.c.bf16 %v3431_v48, %v3426_v51 }
 0x2ce   : > { %v3432_v27 = vpop.trf.xlu0 }
 0x2cf   : > { %3208 = vst [vmem:[%s4780_s28 + $0x18] sm:$0xff] %v3144_v31   ;;  %3216 = vst [vmem:[%s4780_s28 + $0x58] sm:$0xff] %v3184_v33   ;;  %v3436_v20 = vunpack.i.h.bf16 %v3432_v27  ;;  %v3433_v23 = vunpack.i.l.bf16 %v3432_v27 }
 0x2d2   : > { %v3437_v61 = vpop.trf.xlu0 }
 0x2d3   : > { %v3441_v7 = vunpack.i.h.bf16 %v3437_v61  ;;  %v3438_v44 = vunpack.i.l.bf16 %v3437_v61 }
 0x2d5   : > { %v3149_v22 = vpack.c.bf16 %v3438_v44, %v3433_v23  ;;  %v3189_v5 = vpack.c.bf16 %v3441_v7, %v3436_v20 }
 0x2d6   : > { %v3442_v14 = vpop.trf.xlu0 }
 0x2d7   : > { %3209 = vst [vmem:[%s4780_s28 + $0x20] sm:$0xff] %v3149_v22   ;;  %3217 = vst [vmem:[%s4780_s28 + $0x60] sm:$0xff] %v3189_v5   ;;  %v3446_v45 = vunpack.i.h.bf16 %v3442_v14  ;;  %v3443_v39 = vunpack.i.l.bf16 %v3442_v14 }
 0x2da   : > { %v3447_v43 = vpop.trf.xlu0 }
 0x2db   : > { %v3451_v16 = vunpack.i.h.bf16 %v3447_v43  ;;  %v3448_v18 = vunpack.i.l.bf16 %v3447_v43 }
 0x2dd   : > { %v3154_v8 = vpack.c.bf16 %v3448_v18, %v3443_v39  ;;  %v3194_v49 = vpack.c.bf16 %v3451_v16, %v3446_v45 }
 0x2de   : > { %v3452_v50 = vpop.trf.xlu0 }
 0x2df   : > { %3210 = vst [vmem:[%s4780_s28 + $0x28] sm:$0xff] %v3154_v8   ;;  %3218 = vst [vmem:[%s4780_s28 + $0x68] sm:$0xff] %v3194_v49   ;;  %v3456_v60 = vunpack.i.h.bf16 %v3452_v50  ;;  %v3453_v35 = vunpack.i.l.bf16 %v3452_v50 }
 0x2e2   : > { %v3457_v54 = vpop.trf.xlu0 }
 0x2e3   : > { %v3461_v28 = vunpack.i.h.bf16 %v3457_v54  ;;  %v3458_v40 = vunpack.i.l.bf16 %v3457_v54 }
 0x2e5   : > { %v3159_v57 = vpack.c.bf16 %v3458_v40, %v3453_v35  ;;  %v3199_v36 = vpack.c.bf16 %v3461_v28, %v3456_v60 }
 0x2e6   : > { %v3462_v59 = vpop.trf.xlu0 }
 0x2e7   : > { %3211 = vst [vmem:[%s4780_s28 + $0x30] sm:$0xff] %v3159_v57   ;;  %3219 = vst [vmem:[%s4780_s28 + $0x70] sm:$0xff] %v3199_v36   ;;  %v3466_v56 = vunpack.i.h.bf16 %v3462_v59  ;;  %v3463_v10 = vunpack.i.l.bf16 %v3462_v59 }
 0x2ea   : > { %v3467_v6 = vpop.trf.xlu0 }
 0x2eb   : > { %v3471_v12 = vunpack.i.h.bf16 %v3467_v6  ;;  %v3468_v37 = vunpack.i.l.bf16 %v3467_v6 }
 0x2ed   : > { %v3164_v24 = vpack.c.bf16 %v3468_v37, %v3463_v10  ;;  %v3204_v29 = vpack.c.bf16 %v3471_v12, %v3466_v56 }
 0x2ef   : > { %3212 = vst [vmem:[%s4780_s28 + $0x38] sm:$0xff] %v3164_v24   ;;  %3220 = vst [vmem:[%s4780_s28 + $0x78] sm:$0xff] %v3204_v29  }
 0x2f0   : > { %3543 = shalt.err (!%p3540_p0)
}
 0x2f1   : > { %s3544_s17 = scalar_lea.hbm %s4801_s16, 2048  ;;  %s3548_s26 = scalar_lea.hbm %s4869_s12, 4096 }
 0x2f2   : > { %p3545_p1 = scmp.ne.s32.totalorder %s4801_s16, %s3544_s17  ;;  %p3549_p5 = scmp.lt.u32.totalorder %s4801_s16, %s4869_s12 }
 0x2f3   : > { %p3550_p6 = scmp.lt.u32.totalorder %s3548_s26, %s3544_s17  ;;  %p3552_p9 = scmp.lt.u32.totalorder %s3544_s17, %s4801_s16 }
 0x2f4   : > { %p3546_p2 = pnand %p3545_p1, %p3740_p4 }
 0x2f5   : > { %p3551_p7 = por %p3550_p6, %p3549_p5 }
 0x2f6   : > { %p3547_p3 = pneg %p3546_p2 }
 0x2f7   : > { %p3553_p10 = por %p3552_p9, %p3551_p7 }
 0x2f9   : > { %p3554_p11 = pnand %p3553_p10, %p3547_p3 }
 0x2fb   : > { %3557 = shalt.err (!%p3554_p11)
}
 0x2fc   : > { %s3621_s20 = smov 64   ;;  %s3622_s0 = smov 4  }
 0x2fd   : > { %3287 = dma.vmem_to_hbm [thread:$0]  (%p3740_p4), %s4803_s19, 2048, %s4801_s16, %s4809_s1, %s3621_s20, %s3621_s20, %s3622_s0  }
 0x2fe PF: > { %s4896_s29 = sld [smem:[#allocation9_spill]]  ;;  %p3303_p12 = scmp.ge.s32.totalorder %s3612_s18, 2 }
 0x300   : > { %p3294_p13 = pnand %p3303_p12, %p3749_p8 }
 0x304   : > { %s2767_s22 = sand.u32 1, %s4896_s29  }
 0x305   : > { %s2768_s21 = scalar_lea.sflag [#allocation3], %s2767_s22 }
 0x306   : > { %3583 = dma.done.wait (!%p3294_p13), %s2768_s21, 2048  }
 0x307   : > { %3585 = vsyncadd (!%p3294_p13), %s2768_s21, 4294965248  ;;  %s4898_s17 = sadd.s32 4294967294, %s3612_s18  }
 0x308   : > { %s2776_s27 = sand.u32 1, %s4898_s17  }
 0x309   : > { %s2777_s15 = scalar_lea.sflag [#allocation5], %s2776_s27 }
 0x30a   : > { %3587 = dma.done.wait (!%p3294_p13), %s2777_s15, 4096  }
 0x30b   : > { %3589 = vsyncadd (!%p3294_p13), %s2777_s15, 4294963200  ;;  %s31_s18 = sadd.s32 1, %s3612_s18   ;;  %s4899_s23 = sld [smem:[#allocation10_spill]] }
 0x30c   : > { %p28_p4 = scmp.ge.s32.totalorder %s31_s18, 4   ;;  %s4900_s15 = sld [smem:[#allocation14_spill]] }
 0x30d   : > { %s4901_s16 = sld [smem:[#allocation11_spill]]  ;;  %s4902_s17 = sld [smem:[#allocation12_spill]] }
 0x30e   : > { %s4903_s29 = smov %s3596_s30  ;;  %30 = sbr.rel (!%p28_p4) target bundleno = 9 (0x9), region = 138 }
 0x311   : > { %s4904_s30 = smov %s4899_s23 }
 0x315   :  { %2791 = vsyncpa [#allocation3], 1 }
 0x316   :  { %2793 = vsyncpa [#allocation3 + $0x1], 1 }
 0x317   :  { %2794 = vsyncpa [#allocation5], 1 }
 0x318   :  { %2796 = vsyncpa [#allocation5 + $0x1], 1 }

</bundles_post_ra>
